<compile_context>
chip_gen: v7x
topology: tpu7x:2x2x1
jax: 0.10.0
libtpu: 0.0.40
codegen_flags: <defaults>
</compile_context>

<pallas_src>
import jax
import jax.numpy as jnp
from jax.experimental import pallas as pl
from jax.experimental.pallas import tpu as pltpu

_VMEM_LIMIT = 48 * 1024 * 1024  # explicit scoped-VMEM budget (safe on v5e/v6e/v7x)


def _round_up(x, m):
    return (x + m - 1) // m * m


def _pick_oc_tile(oc_pad, cap=512):
    """Largest OC tile (<= cap) that divides the 128-padded OC extent."""
    for t in (cap, 256, 128):
        if t <= oc_pad and oc_pad % t == 0:
            return t
    return oc_pad


def _const_spec(block_shape):
    """BlockSpec for a grid-invariant operand (constant index_map).

    Requests single-buffering (no point double-buffering a block whose index never
    changes); falls back to a plain BlockSpec if pipeline_mode/Buffered(1) is not
    supported by the installed JAX version.
    """
    index_map = lambda *_: (0,) * len(block_shape)
    try:
        return pl.BlockSpec(block_shape, index_map,
                            pipeline_mode=pl.Buffered(buffer_count=1))
    except Exception:  # pragma: no cover - older/newer API surface
        return pl.BlockSpec(block_shape, index_map)


# ---------------------------------------------------------------------------
# Fast path: direct convolution, one padded NHWC image per grid step.
# ---------------------------------------------------------------------------
def _direct_conv(xp, w_k, b2d, *, N, Hp, Wp, C, OH, OW, KH, KW, OC_pad,
                 flops, bytes_accessed):
    M_img = OH * OW
    TOC = _pick_oc_tile(OC_pad)
    n_oc = OC_pad // TOC

    def kernel(x_ref, w_ref, b_ref, o_ref):
        # x_ref: (1, Hp, Wp, C)     one zero-padded image (compute dtype)
        # w_ref: (KH*KW, C, TOC)    weight, (kh,kw)-major, lane-dense OC tile
        # b_ref: (1, TOC)           f32 bias (zero-padded)
        # o_ref: (1, OH*OW, TOC)    f32 output, lane-dense
        acc = None
        for kh in range(KH):
            for kw in range(KW):
                # shifted window of the resident image (stride == 1 on this path)
                patch = x_ref[0, kh:kh + OH, kw:kw + OW, :]          # (OH, OW, C)
                patch = patch.reshape(M_img, C)                       # (OH*OW, C)
                contrib = jnp.dot(patch, w_ref[kh * KW + kw],
                                  preferred_element_type=jnp.float32)
                acc = contrib if acc is None else acc + contrib
        o_ref[0] = (acc + b_ref[...]).astype(o_ref.dtype)

    if n_oc == 1:
        w_spec = _const_spec((KH * KW, C, TOC))
        b_spec = _const_spec((1, TOC))
    else:
        w_spec = pl.BlockSpec((KH * KW, C, TOC), lambda n, t: (0, 0, t))
        b_spec = pl.BlockSpec((1, TOC), lambda n, t: (0, t))

    return pl.pallas_call(
        kernel,
        out_shape=jax.ShapeDtypeStruct((N, M_img, OC_pad), jnp.float32),
        grid=(N, n_oc),
        in_specs=[
            pl.BlockSpec((1, Hp, Wp, C), lambda n, t: (n, 0, 0, 0)),
            w_spec,
            b_spec,
        ],
        out_specs=pl.BlockSpec((1, M_img, TOC), lambda n, t: (n, 0, t)),
        compiler_params=pltpu.CompilerParams(
            dimension_semantics=("parallel", "parallel"),
            vmem_limit_bytes=_VMEM_LIMIT),
        cost_estimate=pl.CostEstimate(flops=flops, transcendentals=0,
                                      bytes_accessed=bytes_accessed),
    )(xp, w_k, b2d)                                                   # (N, OH*OW, OC_pad)


# ---------------------------------------------------------------------------
# Fallback path: im2col + tiled matmul (general stride / very large images).
# ---------------------------------------------------------------------------
def _pick_tm(M, Kdim, TOC, in_itemsize, target=512):
    tm = target
    # keep >= 4 grid steps when M allows (pipelining / megacore need work)
    while tm > 128 and M < 4 * tm:
        tm //= 2
    # VMEM budget: patches double-buffered + f32 output double-buffered + weight
    def need(t):
        return (2 * t * _round_up(Kdim, 128) * in_itemsize
                + 2 * t * TOC * 4
                + 2 * _round_up(Kdim, 8) * TOC * in_itemsize)
    while tm > 128 and need(tm) > (24 << 20):
        tm //= 2
    return max(tm, 128)


def _im2col_matmul(patches, w2d, b2d, *, M, Kdim, OC_pad, flops, bytes_accessed):
    TOC = _pick_oc_tile(OC_pad)
    n_oc = OC_pad // TOC
    tm = _pick_tm(M, Kdim, TOC, patches.dtype.itemsize)
    Mpad = _round_up(M, tm)
    if Mpad != M:
        patches = jnp.pad(patches, ((0, Mpad - M), (0, 0)))

    def kernel(p_ref, w_ref, b_ref, o_ref):
        acc = jnp.dot(p_ref[...], w_ref[...], preferred_element_type=jnp.float32)
        o_ref[...] = (acc + b_ref[...]).astype(o_ref.dtype)

    if n_oc == 1:
        w_spec = _const_spec((Kdim, TOC))
        b_spec = _const_spec((1, TOC))
    else:
        w_spec = pl.BlockSpec((Kdim, TOC), lambda i, j: (0, j))
        b_spec = pl.BlockSpec((1, TOC), lambda i, j: (0, j))

    # TODO(synk): very large Kdim (late ResNet layers) would additionally need a
    # K-reduction grid axis with a VMEM accumulator; not required for this module.
    out = pl.pallas_call(
        kernel,
        out_shape=jax.ShapeDtypeStruct((Mpad, OC_pad), jnp.float32),
        grid=(Mpad // tm, n_oc),
        in_specs=[
            pl.BlockSpec((tm, Kdim), lambda i, j: (i, 0)),
            w_spec,
            b_spec,
        ],
        out_specs=pl.BlockSpec((tm, TOC), lambda i, j: (i, j)),
        compiler_params=pltpu.CompilerParams(
            dimension_semantics=("parallel", "parallel"),
            vmem_limit_bytes=_VMEM_LIMIT),
        cost_estimate=pl.CostEstimate(flops=flops, transcendentals=0,
                                      bytes_accessed=bytes_accessed),
    )(patches, w2d, b2d)
    return out[:M]                                                    # (M, OC_pad)


# ---------------------------------------------------------------------------
# Public wrapper (PyTorch PartialConv2d.forward semantics: NCHW in, NCHW out).
# ---------------------------------------------------------------------------
def partial_conv2d(x, weight, bias, *, stride, padding,
                   out_channel_begin, out_channel_end,
                   compute_dtype=jnp.bfloat16):
    """x: (N,C,H,W); weight: (OC_full,C,KH,KW); bias: (OC_full,) or None."""
    w_slice = weight[out_channel_begin:out_channel_end]               # (OCp, C, KH, KW)
    b_slice = None if bias is None else bias[out_channel_begin:out_channel_end]

    N, C, H, W = x.shape
    OCp, _, KH, KW = w_slice.shape
    sh, sw = (stride, stride) if isinstance(stride, int) else tuple(stride)
    ph, pw = (padding, padding) if isinstance(padding, int) else tuple(padding)
    OH = (H + 2 * ph - KH) // sh + 1
    OW = (W + 2 * pw - KW) // sw + 1
    Hp, Wp = H + 2 * ph, W + 2 * pw

    OC_pad = _round_up(max(OCp, 1), 128)          # lane-dense output (unmasked vst)
    esize = jnp.dtype(compute_dtype).itemsize

    # Channels-last + zero pad + compute-dtype cast (single glue pass over x).
    x_nhwc = jnp.transpose(x, (0, 2, 3, 1))
    xp = jnp.pad(x_nhwc, ((0, 0), (ph, ph), (pw, pw), (0, 0))).astype(compute_dtype)

    # Weight -> (KH*KW, C, OC_pad), (kh, kw)-major; bias -> (1, OC_pad) f32.
    w_k = jnp.transpose(w_slice, (2, 3, 1, 0)).reshape(KH * KW, C, OCp)
    w_k = jnp.pad(w_k, ((0, 0), (0, 0), (0, OC_pad - OCp))).astype(compute_dtype)
    b2d = jnp.zeros((1, OC_pad), jnp.float32)
    if b_slice is not None:
        b2d = b2d.at[0, :OCp].set(b_slice.astype(jnp.float32))

    flops = 2 * N * OH * OW * KH * KW * C * OCp
    bytes_accessed = (int(xp.size) * esize + int(w_k.size) * esize
                      + N * OH * OW * OC_pad * 4)

    # VMEM footprint estimate of the direct path (lane/sublane padded, 2x buffered I/O).
    TOC_est = _pick_oc_tile(OC_pad)
    direct_vmem = (2 * Hp * _round_up(Wp, 8) * _round_up(C, 128) * esize
                   + 2 * _round_up(OH * OW, 8) * TOC_est * 4
                   + 2 * KH * KW * _round_up(C, 8) * TOC_est * esize)

    if sh == 1 and sw == 1 and direct_vmem <= (40 << 20):
        out2d = _direct_conv(xp, w_k, b2d, N=N, Hp=Hp, Wp=Wp, C=C, OH=OH, OW=OW,
                             KH=KH, KW=KW, OC_pad=OC_pad,
                             flops=flops, bytes_accessed=bytes_accessed)
        out = out2d.reshape(N, OH, OW, OC_pad)[..., :OCp]
    else:
        # TODO(synk): stride > 1 could also DMA strided windows in-kernel; for now
        # fall back to a lane-dense, bf16, large-row-tile im2col matmul.
        cols = []
        for kh in range(KH):
            for kw in range(KW):
                cols.append(xp[:, kh:kh + sh * (OH - 1) + 1:sh,
                                kw:kw + sw * (OW - 1) + 1:sw, :])     # (N, OH, OW, C)
        patches = jnp.stack(cols, axis=3).reshape(N * OH * OW, KH * KW * C)
        w2d = w_k.reshape(KH * KW * C, OC_pad)
        out2d = _im2col_matmul(patches, w2d, b2d, M=N * OH * OW, Kdim=KH * KW * C,
                               OC_pad=OC_pad, flops=flops, bytes_accessed=bytes_accessed)
        out = out2d.reshape(N, OH, OW, OC_pad)[..., :OCp]

    # Back to NCHW to match torch.nn.Conv2d (small, output-sized transpose only).
    return jnp.transpose(out, (0, 3, 1, 2))


if __name__ == "__main__":
    # Original conv: in_channels=4, out_channels=8, 3x3, stride=1, pad=1, bias=True.
    # PartialConv2d slice: output channels [2, 6) -> 4 channels.
    N, C, H, W = 2, 4, 16, 16
    OC_full, KH, KW = 8, 3, 3
    stride, padding = 1, 1
    oc_begin, oc_end = 2, 6

    key = jax.random.PRNGKey(0)
    kx, kwt, kb = jax.random.split(key, 3)
    x = jax.random.normal(kx, (N, C, H, W), dtype=jnp.float32)
    weight = jax.random.normal(kwt, (OC_full, C, KH, KW), dtype=jnp.float32) * 0.1
    bias = jax.random.normal(kb, (OC_full,), dtype=jnp.float32) * 0.1

    # Reference: XLA conv with the same semantics as torch.nn.Conv2d.
    ref = jax.lax.conv_general_dilated(
        x, weight[oc_begin:oc_end],
        window_strides=(stride, stride),
        padding=((padding, padding), (padding, padding)),
        dimension_numbers=("NCHW", "OIHW", "NCHW"),
        precision=jax.lax.Precision.HIGHEST,
    ) + bias[oc_begin:oc_end].reshape(1, -1, 1, 1)

    fwd_f32 = jax.jit(lambda a, w, b: partial_conv2d(
        a, w, b, stride=stride, padding=padding,
        out_channel_begin=oc_begin, out_channel_end=oc_end,
        compute_dtype=jnp.float32))
    fwd_bf16 = jax.jit(lambda a, w, b: partial_conv2d(
        a, w, b, stride=stride, padding=padding,
        out_channel_begin=oc_begin, out_channel_end=oc_end))  # default bf16 compute

    out_f32 = jax.block_until_ready(fwd_f32(x, weight, bias))
    assert out_f32.shape == (N, oc_end - oc_begin, H, W)
    assert jnp.allclose(out_f32, ref, atol=1e-4, rtol=1e-4)

    out_bf16 = jax.block_until_ready(fwd_bf16(x, weight, bias))
    assert out_bf16.shape == (N, oc_end - oc_begin, H, W)
    assert jnp.allclose(out_bf16, ref, atol=5e-2, rtol=5e-2)  # bf16 inputs, f32 accumulation

    print("KERNEL_OK")
</pallas_src>

<mosaic_0001>
module attributes {stable_mosaic.version = 11 : i64} {
  func.func @kernel(%arg0: i32, %arg1: i32, %arg2: memref<1x18x18x4xf32, #tpu.memory_space<vmem>>, %arg3: memref<9x4x128xf32, #tpu.memory_space<vmem>>, %arg4: memref<1x128xf32, #tpu.memory_space<vmem>>, %arg5: memref<1x256x128xf32, #tpu.memory_space<vmem>>) attributes {dimension_semantics = [#tpu.dimension_semantics<parallel>, #tpu.dimension_semantics<parallel>], iteration_bounds = array<i64: 2, 1>, scalar_prefetch = 0 : i64, scratch_operands = 0 : i64, tpu.core_type = #tpu.core_type<tc>, window_params = [{transform_indices = @transform_0, window_bounds = array<i64: 1, 18, 18, 4>}, {pipeline_mode = #tpu.pipeline_mode<synchronous>, transform_indices = @transform_1, window_bounds = array<i64: 9, 4, 128>}, {pipeline_mode = #tpu.pipeline_mode<synchronous>, transform_indices = @transform_2, window_bounds = array<i64: 1, 128>}, {transform_indices = @transform_3, window_bounds = array<i64: 1, 256, 128>}]} {
    %c0 = arith.constant 0 : index
    %c0_0 = arith.constant 0 : index
    %c0_1 = arith.constant 0 : index
    %c0_2 = arith.constant 0 : index
    %0 = vector.load %arg2[%c0, %c0_0, %c0_1, %c0_2] : memref<1x18x18x4xf32, #tpu.memory_space<vmem>>, vector<1x16x16x4xf32>
    %1 = vector.shape_cast %0 : vector<1x16x16x4xf32> to vector<16x16x4xf32>
    %2 = vector.shape_cast %1 : vector<16x16x4xf32> to vector<256x4xf32>
    %c0_3 = arith.constant 0 : index
    %c0_4 = arith.constant 0 : index
    %c0_5 = arith.constant 0 : index
    %3 = vector.load %arg3[%c0_3, %c0_4, %c0_5] : memref<9x4x128xf32, #tpu.memory_space<vmem>>, vector<1x4x128xf32>
    %4 = vector.shape_cast %3 : vector<1x4x128xf32> to vector<4x128xf32>
    %cst = arith.constant dense<0.000000e+00> : vector<256x128xf32>
    %5 = tpu.matmul %2, %4, %cst {dimension_numbers = #tpu.dot_dimension_numbers<[1], [0], [0], [1], [0, 0, 1, 1], [], []>} : vector<256x4xf32>, vector<4x128xf32>, vector<256x128xf32> -> vector<256x128xf32>
    %c0_6 = arith.constant 0 : index
    %c0_7 = arith.constant 0 : index
    %c1 = arith.constant 1 : index
    %c0_8 = arith.constant 0 : index
    %6 = vector.load %arg2[%c0_6, %c0_7, %c1, %c0_8] : memref<1x18x18x4xf32, #tpu.memory_space<vmem>>, vector<1x16x16x4xf32>
    %7 = vector.shape_cast %6 : vector<1x16x16x4xf32> to vector<16x16x4xf32>
    %8 = vector.shape_cast %7 : vector<16x16x4xf32> to vector<256x4xf32>
    %c1_9 = arith.constant 1 : index
    %c0_10 = arith.constant 0 : index
    %c0_11 = arith.constant 0 : index
    %9 = vector.load %arg3[%c1_9, %c0_10, %c0_11] : memref<9x4x128xf32, #tpu.memory_space<vmem>>, vector<1x4x128xf32>
    %10 = vector.shape_cast %9 : vector<1x4x128xf32> to vector<4x128xf32>
    %cst_12 = arith.constant dense<0.000000e+00> : vector<256x128xf32>
    %11 = tpu.matmul %8, %10, %cst_12 {dimension_numbers = #tpu.dot_dimension_numbers<[1], [0], [0], [1], [0, 0, 1, 1], [], []>} : vector<256x4xf32>, vector<4x128xf32>, vector<256x128xf32> -> vector<256x128xf32>
    %12 = arith.addf %5, %11 : vector<256x128xf32>
    %c0_13 = arith.constant 0 : index
    %c0_14 = arith.constant 0 : index
    %c2 = arith.constant 2 : index
    %c0_15 = arith.constant 0 : index
    %13 = vector.load %arg2[%c0_13, %c0_14, %c2, %c0_15] : memref<1x18x18x4xf32, #tpu.memory_space<vmem>>, vector<1x16x16x4xf32>
    %14 = vector.shape_cast %13 : vector<1x16x16x4xf32> to vector<16x16x4xf32>
    %15 = vector.shape_cast %14 : vector<16x16x4xf32> to vector<256x4xf32>
    %c2_16 = arith.constant 2 : index
    %c0_17 = arith.constant 0 : index
    %c0_18 = arith.constant 0 : index
    %16 = vector.load %arg3[%c2_16, %c0_17, %c0_18] : memref<9x4x128xf32, #tpu.memory_space<vmem>>, vector<1x4x128xf32>
    %17 = vector.shape_cast %16 : vector<1x4x128xf32> to vector<4x128xf32>
    %cst_19 = arith.constant dense<0.000000e+00> : vector<256x128xf32>
    %18 = tpu.matmul %15, %17, %cst_19 {dimension_numbers = #tpu.dot_dimension_numbers<[1], [0], [0], [1], [0, 0, 1, 1], [], []>} : vector<256x4xf32>, vector<4x128xf32>, vector<256x128xf32> -> vector<256x128xf32>
    %19 = arith.addf %12, %18 : vector<256x128xf32>
    %c0_20 = arith.constant 0 : index
    %c1_21 = arith.constant 1 : index
    %c0_22 = arith.constant 0 : index
    %c0_23 = arith.constant 0 : index
    %20 = vector.load %arg2[%c0_20, %c1_21, %c0_22, %c0_23] : memref<1x18x18x4xf32, #tpu.memory_space<vmem>>, vector<1x16x16x4xf32>
    %21 = vector.shape_cast %20 : vector<1x16x16x4xf32> to vector<16x16x4xf32>
    %22 = vector.shape_cast %21 : vector<16x16x4xf32> to vector<256x4xf32>
    %c3 = arith.constant 3 : index
    %c0_24 = arith.constant 0 : index
    %c0_25 = arith.constant 0 : index
    %23 = vector.load %arg3[%c3, %c0_24, %c0_25] : memref<9x4x128xf32, #tpu.memory_space<vmem>>, vector<1x4x128xf32>
    %24 = vector.shape_cast %23 : vector<1x4x128xf32> to vector<4x128xf32>
    %cst_26 = arith.constant dense<0.000000e+00> : vector<256x128xf32>
    %25 = tpu.matmul %22, %24, %cst_26 {dimension_numbers = #tpu.dot_dimension_numbers<[1], [0], [0], [1], [0, 0, 1, 1], [], []>} : vector<256x4xf32>, vector<4x128xf32>, vector<256x128xf32> -> vector<256x128xf32>
    %26 = arith.addf %19, %25 : vector<256x128xf32>
    %c0_27 = arith.constant 0 : index
    %c1_28 = arith.constant 1 : index
    %c1_29 = arith.constant 1 : index
    %c0_30 = arith.constant 0 : index
    %27 = vector.load %arg2[%c0_27, %c1_28, %c1_29, %c0_30] : memref<1x18x18x4xf32, #tpu.memory_space<vmem>>, vector<1x16x16x4xf32>
    %28 = vector.shape_cast %27 : vector<1x16x16x4xf32> to vector<16x16x4xf32>
    %29 = vector.shape_cast %28 : vector<16x16x4xf32> to vector<256x4xf32>
    %c4 = arith.constant 4 : index
    %c0_31 = arith.constant 0 : index
    %c0_32 = arith.constant 0 : index
    %30 = vector.load %arg3[%c4, %c0_31, %c0_32] : memref<9x4x128xf32, #tpu.memory_space<vmem>>, vector<1x4x128xf32>
    %31 = vector.shape_cast %30 : vector<1x4x128xf32> to vector<4x128xf32>
    %cst_33 = arith.constant dense<0.000000e+00> : vector<256x128xf32>
    %32 = tpu.matmul %29, %31, %cst_33 {dimension_numbers = #tpu.dot_dimension_numbers<[1], [0], [0], [1], [0, 0, 1, 1], [], []>} : vector<256x4xf32>, vector<4x128xf32>, vector<256x128xf32> -> vector<256x128xf32>
    %33 = arith.addf %26, %32 : vector<256x128xf32>
    %c0_34 = arith.constant 0 : index
    %c1_35 = arith.constant 1 : index
    %c2_36 = arith.constant 2 : index
    %c0_37 = arith.constant 0 : index
    %34 = vector.load %arg2[%c0_34, %c1_35, %c2_36, %c0_37] : memref<1x18x18x4xf32, #tpu.memory_space<vmem>>, vector<1x16x16x4xf32>
    %35 = vector.shape_cast %34 : vector<1x16x16x4xf32> to vector<16x16x4xf32>
    %36 = vector.shape_cast %35 : vector<16x16x4xf32> to vector<256x4xf32>
    %c5 = arith.constant 5 : index
    %c0_38 = arith.constant 0 : index
    %c0_39 = arith.constant 0 : index
    %37 = vector.load %arg3[%c5, %c0_38, %c0_39] : memref<9x4x128xf32, #tpu.memory_space<vmem>>, vector<1x4x128xf32>
    %38 = vector.shape_cast %37 : vector<1x4x128xf32> to vector<4x128xf32>
    %cst_40 = arith.constant dense<0.000000e+00> : vector<256x128xf32>
    %39 = tpu.matmul %36, %38, %cst_40 {dimension_numbers = #tpu.dot_dimension_numbers<[1], [0], [0], [1], [0, 0, 1, 1], [], []>} : vector<256x4xf32>, vector<4x128xf32>, vector<256x128xf32> -> vector<256x128xf32>
    %40 = arith.addf %33, %39 : vector<256x128xf32>
    %c0_41 = arith.constant 0 : index
    %c2_42 = arith.constant 2 : index
    %c0_43 = arith.constant 0 : index
    %c0_44 = arith.constant 0 : index
    %41 = vector.load %arg2[%c0_41, %c2_42, %c0_43, %c0_44] : memref<1x18x18x4xf32, #tpu.memory_space<vmem>>, vector<1x16x16x4xf32>
    %42 = vector.shape_cast %41 : vector<1x16x16x4xf32> to vector<16x16x4xf32>
    %43 = vector.shape_cast %42 : vector<16x16x4xf32> to vector<256x4xf32>
    %c6 = arith.constant 6 : index
    %c0_45 = arith.constant 0 : index
    %c0_46 = arith.constant 0 : index
    %44 = vector.load %arg3[%c6, %c0_45, %c0_46] : memref<9x4x128xf32, #tpu.memory_space<vmem>>, vector<1x4x128xf32>
    %45 = vector.shape_cast %44 : vector<1x4x128xf32> to vector<4x128xf32>
    %cst_47 = arith.constant dense<0.000000e+00> : vector<256x128xf32>
    %46 = tpu.matmul %43, %45, %cst_47 {dimension_numbers = #tpu.dot_dimension_numbers<[1], [0], [0], [1], [0, 0, 1, 1], [], []>} : vector<256x4xf32>, vector<4x128xf32>, vector<256x128xf32> -> vector<256x128xf32>
    %47 = arith.addf %40, %46 : vector<256x128xf32>
    %c0_48 = arith.constant 0 : index
    %c2_49 = arith.constant 2 : index
    %c1_50 = arith.constant 1 : index
    %c0_51 = arith.constant 0 : index
    %48 = vector.load %arg2[%c0_48, %c2_49, %c1_50, %c0_51] : memref<1x18x18x4xf32, #tpu.memory_space<vmem>>, vector<1x16x16x4xf32>
    %49 = vector.shape_cast %48 : vector<1x16x16x4xf32> to vector<16x16x4xf32>
    %50 = vector.shape_cast %49 : vector<16x16x4xf32> to vector<256x4xf32>
    %c7 = arith.constant 7 : index
    %c0_52 = arith.constant 0 : index
    %c0_53 = arith.constant 0 : index
    %51 = vector.load %arg3[%c7, %c0_52, %c0_53] : memref<9x4x128xf32, #tpu.memory_space<vmem>>, vector<1x4x128xf32>
    %52 = vector.shape_cast %51 : vector<1x4x128xf32> to vector<4x128xf32>
    %cst_54 = arith.constant dense<0.000000e+00> : vector<256x128xf32>
    %53 = tpu.matmul %50, %52, %cst_54 {dimension_numbers = #tpu.dot_dimension_numbers<[1], [0], [0], [1], [0, 0, 1, 1], [], []>} : vector<256x4xf32>, vector<4x128xf32>, vector<256x128xf32> -> vector<256x128xf32>
    %54 = arith.addf %47, %53 : vector<256x128xf32>
    %c0_55 = arith.constant 0 : index
    %c2_56 = arith.constant 2 : index
    %c2_57 = arith.constant 2 : index
    %c0_58 = arith.constant 0 : index
    %55 = vector.load %arg2[%c0_55, %c2_56, %c2_57, %c0_58] : memref<1x18x18x4xf32, #tpu.memory_space<vmem>>, vector<1x16x16x4xf32>
    %56 = vector.shape_cast %55 : vector<1x16x16x4xf32> to vector<16x16x4xf32>
    %57 = vector.shape_cast %56 : vector<16x16x4xf32> to vector<256x4xf32>
    %c8 = arith.constant 8 : index
    %c0_59 = arith.constant 0 : index
    %c0_60 = arith.constant 0 : index
    %58 = vector.load %arg3[%c8, %c0_59, %c0_60] : memref<9x4x128xf32, #tpu.memory_space<vmem>>, vector<1x4x128xf32>
    %59 = vector.shape_cast %58 : vector<1x4x128xf32> to vector<4x128xf32>
    %cst_61 = arith.constant dense<0.000000e+00> : vector<256x128xf32>
    %60 = tpu.matmul %57, %59, %cst_61 {dimension_numbers = #tpu.dot_dimension_numbers<[1], [0], [0], [1], [0, 0, 1, 1], [], []>} : vector<256x4xf32>, vector<4x128xf32>, vector<256x128xf32> -> vector<256x128xf32>
    %61 = arith.addf %54, %60 : vector<256x128xf32>
    %c0_62 = arith.constant 0 : index
    %c0_63 = arith.constant 0 : index
    %62 = vector.load %arg4[%c0_62, %c0_63] : memref<1x128xf32, #tpu.memory_space<vmem>>, vector<1x128xf32>
    %63 = vector.broadcast %62 : vector<1x128xf32> to vector<256x128xf32>
    %64 = arith.addf %61, %63 : vector<256x128xf32>
    %c0_64 = arith.constant 0 : index
    %c0_65 = arith.constant 0 : index
    %c0_66 = arith.constant 0 : index
    %65 = vector.load %arg5[%c0_64, %c0_65, %c0_66] : memref<1x256x128xf32, #tpu.memory_space<vmem>>, vector<1x256x128xf32>
    %66 = vector.shape_cast %65 : vector<1x256x128xf32> to vector<256x128xf32>
    %67 = vector.shape_cast %64 : vector<256x128xf32> to vector<1x256x128xf32>
    tpu.vector_store %arg5[%c0_64, %c0_65, %c0_66], %67 {strides = array<i32>} : memref<1x256x128xf32, #tpu.memory_space<vmem>>, vector<1x256x128xf32>,
    return
  }
  func.func @transform_0(%arg0: i32, %arg1: i32) -> (i32, i32, i32, i32) {
    %c0_i32 = arith.constant 0 : i32
    %c0_i32_0 = arith.constant 0 : i32
    %c0_i32_1 = arith.constant 0 : i32
    %c0_i32_2 = arith.constant 0 : i32
    return %arg0, %c0_i32, %c0_i32_0, %c0_i32_1 : i32, i32, i32, i32
  }
  func.func @transform_1(%arg0: i32, %arg1: i32) -> (i32, i32, i32) {
    %c0_i32 = arith.constant 0 : i32
    %c0_i32_0 = arith.constant 0 : i32
    %c0_i32_1 = arith.constant 0 : i32
    %c0_i32_2 = arith.constant 0 : i32
    return %c0_i32, %c0_i32_0, %c0_i32_1 : i32, i32, i32
  }
  func.func @transform_2(%arg0: i32, %arg1: i32) -> (i32, i32) {
    %c0_i32 = arith.constant 0 : i32
    %c0_i32_0 = arith.constant 0 : i32
    %c0_i32_1 = arith.constant 0 : i32
    return %c0_i32, %c0_i32_0 : i32, i32
  }
  func.func @transform_3(%arg0: i32, %arg1: i32) -> (i32, i32, i32) {
    %c0_i32 = arith.constant 0 : i32
    %c0_i32_0 = arith.constant 0 : i32
    return %arg0, %c0_i32, %arg1 : i32, i32, i32
  }
}

</mosaic_0001>

<bundles_post_ra>
// kernel: _lambda_.1
= control target key start
LH: loop header
LB: loop body
LE: loop exit
PB: predicated region body
PF: predicated region fallthrough
CT: control target
= control target key end

     0   :  { %s5371_s12 = smov 0   ;;  %s5373_s13 = smov 0   ;;  %s6409_s0 = inlined_call_operand.vmem [shape: f32[2,18,18,4], index: 0, kind: input, shape index: {}]   ;;  %s6410_s1 = inlined_call_operand.vmem [shape: f32[9,4,128], index: 1, kind: input, shape index: {}]   ;;  %s6411_s2 = inlined_call_operand.vmem [shape: f32[1,128], index: 2, kind: input, shape index: {}]   ;;  %s6412_s3 = inlined_call_operand.vmem [shape: f32[2,256,128], index: 3, kind: output, shape index: {}]  }
   0x1   :  { %s5375_s14 = smov 0  }
   0x2 LB: > { %s25_s15 = sadd.s32 1, %s5345_s13  ;;  %p3792_p0 = scmp.ge.s32.totalorder %s5349_s14, 1  ;;  %s5349_s14 = sphi %s5375_s14, %s13_s14   ;;  %s5345_s13 = sphi %s5373_s13, %s6523_s13   ;;  %s5341_s12 = sphi %s5371_s12, %s6522_s12  }
   0x3   : > { %p27_p1 = scmp.ge.s32.totalorder %s25_s15, 2  ;;  %p151_p2 = scmp.lt.s32.totalorder %s5349_s14, 3 }
   0x5   : > { %s6525_s15 = smov (%p27_p1, %s25_s15), 0  ;;  %p152_p3 = pnand %p3792_p0, %p151_p2 }
   0x7   : > { %155 = sbr.rel (%p152_p3) target bundleno = 524 (0x20c), region = 32 }
   0xe   : > { %v3796_v0 = vld [vmem:[%s6410_s1 + $0x4] sm:$0xf]  ;;  %vm355_vm0 = vcmask 1043456   ;;  %v5395_v1 = vld [vmem:[%s6410_s1 + $0x10] sm:$0xf]  ;;  %p178_p4 = scmp.lt.s32.totalorder %s5341_s12, 1 }
   0xf   : > { %4594 = vmatprep.subr.msk.mxu1 %vm355_vm0, %v3796_v0  ;;  %4794 = vmatprep.subr.msk.mxu0 %vm355_vm0, %v5395_v1  ;;  %v223_v2 = vld [vmem:[%s6410_s1] sm:$0xf]  ;;  %v4061_v3 = vld [vmem:[%s6410_s1 + $0x14] sm:$0xf]  ;;  %vm258_vm1 = vcmask 31744  }
  0x10   : > { %4595 = vmatpush3.msk.msra.mxu1 %vm355_vm0, %v3796_v0  ;;  %4795 = vmatpush3.msk.msra.mxu0 %vm355_vm0, %v5395_v1  ;;  %s6527_s12 = smov (!%p178_p4, %s5341_s12), 1  ;;  %v4127_v9 = vld [vmem:[%s6410_s1 + $0x18] sm:$0xf]  ;;  %v5436_v10 = vld [vmem:[%s6410_s1 + $0x8] sm:$0xf] }
  0x11   : > { %4644 = vmatprep.subr.msk.mxu1 %vm355_vm0, %v223_v2  ;;  %4844 = vmatprep.subr.msk.mxu0 %vm355_vm0, %v4061_v3  ;;  %s5302_s24 = smul.u32 432, %s6527_s12  ;;  %v5555_v28 = vld [vmem:[%s6410_s1 + $0x1c] sm:$0xf]  ;;  %v5718_v61 = vld [vmem:[%s6410_s1 + $0xc] sm:$0xf]  ;;  %s4296_s11 = sshll.u32 %s6527_s12, 8 }
  0x12   : > { %s6333_s20 = scalar_lea.vmem %s6412_s3, %s4296_s11 }
  0x13   : > { %s5417_s27 = scalar_lea.vmem %s6409_s0, %s5302_s24 }
  0x14   : > { %v224_v4 = vld [vmem:[%s5417_s27 + $0x1] sm:$0xff]  ;;  %v3963_v5 = vld [vmem:[%s5417_s27 + $0x19] sm:$0xff]  ;;  %v225_v6 = vld [vmem:[%s5417_s27 + $0x9] sm:$0xff] }
  0x15   : > { %4596 = vmatprep.mubr.msk.f32.mxu1 %vm258_vm1, %v224_v4  ;;  %4796 = vmatprep.mubr.msk.f32.mxu0 %vm258_vm1, %v3963_v5  ;;  %v3964_v7 = vld [vmem:[%s5417_s27 + $0x21] sm:$0xff]  ;;  %v5426_v8 = vld [vmem:[%s5417_s27 + $0x31] sm:$0xff]  ;;  %v5441_v11 = vld [vmem:[%s5417_s27 + $0x39] sm:$0xff] }
  0x16   : > { %4597 = vmatmul.mubr.msk.f32.vlgmr.msra.gmra.mrb[0].mxu1 %vm258_vm1, %v225_v6  ;;  %4797 = vmatmul.mubr.msk.f32.vlgmr.msra.gmra.mrb[0].mxu0 %vm258_vm1, %v3964_v7  ;;  %v5447_v12 = vld [vmem:[%s5417_s27 + $0x49] sm:$0xff]  ;;  %v5460_v13 = vld [vmem:[%s5417_s27 + $0x51] sm:$0xff]  ;;  %v5463_v14 = vld [vmem:[%s5417_s27 + $0x61] sm:$0xff] }
  0x17   : > { %4645 = vmatpush3.msk.msra.mxu1 %vm355_vm0, %v223_v2  ;;  %4845 = vmatpush3.msk.msra.mxu0 %vm355_vm0, %v4061_v3  ;;  %v5474_v15 = vld [vmem:[%s5417_s27 + $0x69] sm:$0xff]  ;;  %v5477_v16 = vld [vmem:[%s5417_s27 + $0x79] sm:$0xff]  ;;  %v5488_v17 = vld [vmem:[%s5417_s27 + $0x81] sm:$0xff] }
  0x18   : > { %4599 = vmatprep.mubr.msk.f32.mxu1 %vm258_vm1, %v3963_v5  ;;  %4799 = vmatprep.mubr.msk.f32.mxu0 %vm258_vm1, %v5426_v8  ;;  %v5491_v18 = vld [vmem:[%s5417_s27 + $0x91] sm:$0xff]  ;;  %v5502_v19 = vld [vmem:[%s5417_s27 + $0x99] sm:$0xff]  ;;  %v5505_v20 = vld [vmem:[%s5417_s27 + $0xa9] sm:$0xff] }
  0x19   : > { %4894 = vmatprep.subr.msk.mxu0 %vm355_vm0, %v4127_v9  ;;  %4694 = vmatprep.subr.msk.mxu1 %vm355_vm0, %v5436_v10  ;;  %v5516_v21 = vld [vmem:[%s5417_s27 + $0xb1] sm:$0xff]  ;;  %v5519_v22 = vld [vmem:[%s5417_s27 + $0xc1] sm:$0xff]  ;;  %v5530_v23 = vld [vmem:[%s5417_s27 + $0xc9] sm:$0xff] }
  0x1a   : > { %4600 = vmatmul.mubr.msk.f32.gmra.mrb[2].mxu1 %vm258_vm1, %v3964_v7  ;;  %4800 = vmatmul.mubr.msk.f32.gmra.mrb[2].mxu0 %vm258_vm1, %v5441_v11  ;;  %v5533_v24 = vld [vmem:[%s5417_s27 + $0x1a] sm:$0xff]  ;;  %v5544_v25 = vld [vmem:[%s5417_s27 + $0x22] sm:$0xff]  ;;  %v5550_v27 = vld [vmem:[%s5417_s27 + $0x32] sm:$0xff] }
  0x1b   : > { %4602 = vmatprep.mubr.msk.f32.mxu1 %vm258_vm1, %v5426_v8  ;;  %4802 = vmatprep.mubr.msk.f32.mxu0 %vm258_vm1, %v5447_v12  ;;  %v5547_v26 = vld [vmem:[%s5417_s27 + $0xd9] sm:$0xff]  ;;  %v5565_v29 = vld [vmem:[%s5417_s27 + $0xe1] sm:$0xff]  ;;  %v5573_v31 = vld [vmem:[%s5417_s27 + $0xf1] sm:$0xff] }
  0x1c   : > { %6458 = vst [vmem:[#allocation2_spill] sm:$0xff] %v5565_v29  ;;  %v5568_v30 = vld [vmem:[%s5417_s27 + $0x3a] sm:$0xff]  ;;  %6459 = vst [vmem:[#allocation3_spill] sm:$0xff] %v5573_v31  ;;  %v5576_v32 = vld [vmem:[%s5417_s27 + $0x4a] sm:$0xff] }
  0x1d   : > { %v5589_v33 = vld [vmem:[%s5417_s27 + $0xf9] sm:$0xff]  ;;  %v5595_v35 = vld [vmem:[%s5417_s27 + $0x109] sm:$0xff]  ;;  %v5609_v37 = vld [vmem:[%s5417_s27 + $0x111] sm:$0xff] }
  0x1e   : > { %4603 = vmatmul.mubr.msk.f32.gmra.mrb[4].mxu1 %vm258_vm1, %v5441_v11  ;;  %4803 = vmatmul.mubr.msk.f32.gmra.mrb[4].mxu0 %vm258_vm1, %v5460_v13  ;;  %6460 = vst [vmem:[#allocation4_spill] sm:$0xff] %v5589_v33  ;;  %v5592_v34 = vld [vmem:[%s5417_s27 + $0x52] sm:$0xff]  ;;  %6461 = vst [vmem:[#allocation5_spill] sm:$0xff] %v5595_v35  ;;  %v5598_v36 = vld [vmem:[%s5417_s27 + $0x62] sm:$0xff] }
  0x1f   : > { %4605 = vmatprep.mubr.msk.f32.mxu1 %vm258_vm1, %v5447_v12  ;;  %4805 = vmatprep.mubr.msk.f32.mxu0 %vm258_vm1, %v5463_v14  ;;  %6462 = vst [vmem:[#allocation6_spill] sm:$0xff] %v5609_v37  ;;  %v5612_v38 = vld [vmem:[%s5417_s27 + $0x6a] sm:$0xff]  ;;  %v5615_v39 = vld [vmem:[%s5417_s27 + $0x121] sm:$0xff]  ;;  %v5635_v43 = vld [vmem:[%s5417_s27 + $0x139] sm:$0xff] }
  0x20   : > { %6463 = vst [vmem:[#allocation7_spill] sm:$0xff] %v5615_v39  ;;  %v5618_v40 = vld [vmem:[%s5417_s27 + $0x7a] sm:$0xff]  ;;  %v5629_v41 = vld [vmem:[%s5417_s27 + $0x129] sm:$0xff]  ;;  %6465 = vst [vmem:[#allocation9_spill] sm:$0xff] %v5635_v43 }
  0x21   : > { %6464 = vst [vmem:[#allocation8_spill] sm:$0xff] %v5629_v41  ;;  %v5632_v42 = vld [vmem:[%s5417_s27 + $0x82] sm:$0xff]  ;;  %v5638_v44 = vld [vmem:[%s5417_s27 + $0x92] sm:$0xff]  ;;  %v5652_v46 = vld [vmem:[%s5417_s27 + $0x9a] sm:$0xff] }
  0x22   : > { %4606 = vmatmul.mubr.msk.f32.gmra.mrb[6].mxu1 %vm258_vm1, %v5460_v13  ;;  %4806 = vmatmul.mubr.msk.f32.gmra.mrb[6].mxu0 %vm258_vm1, %v5474_v15  ;;  %v5649_v45 = vld [vmem:[%s5417_s27 + $0x141] sm:$0xff]  ;;  %v5655_v47 = vld [vmem:[%s5417_s27 + $0x151] sm:$0xff]  ;;  %v5669_v49 = vld [vmem:[%s5417_s27 + $0x159] sm:$0xff] }
  0x23   : > { %4608 = vmatprep.mubr.msk.f32.mxu1 %vm258_vm1, %v5463_v14  ;;  %4808 = vmatprep.mubr.msk.f32.mxu0 %vm258_vm1, %v5477_v16  ;;  %6466 = vst [vmem:[#allocation10_spill] sm:$0xff] %v5649_v45  ;;  %6467 = vst [vmem:[#allocation11_spill] sm:$0xff] %v5655_v47  ;;  %v5658_v48 = vld [vmem:[%s5417_s27 + $0xaa] sm:$0xff]  ;;  %v5672_v50 = vld [vmem:[%s5417_s27 + $0xb2] sm:$0xff] }
  0x24   : > { %6468 = vst [vmem:[#allocation12_spill] sm:$0xff] %v5669_v49  ;;  %v5675_v51 = vld [vmem:[%s5417_s27 + $0x169] sm:$0xff]  ;;  %v5689_v53 = vld [vmem:[%s5417_s27 + $0x171] sm:$0xff]  ;;  %v191_v55 = vld [vmem:[%s5417_s27] sm:$0xff] }
  0x25   : > { %6469 = vst [vmem:[#allocation13_spill] sm:$0xff] %v5675_v51  ;;  %v5678_v52 = vld [vmem:[%s5417_s27 + $0xc2] sm:$0xff]  ;;  %6470 = vst [vmem:[#allocation14_spill] sm:$0xff] %v5689_v53  ;;  %v5692_v54 = vld [vmem:[%s5417_s27 + $0xca] sm:$0xff] }
  0x26   : > { %4609 = vmatmul.mubr.msk.f32.gmra.mrb[8].mxu1 %vm258_vm1, %v5474_v15  ;;  %4809 = vmatmul.mubr.msk.f32.gmra.mrb[8].mxu0 %vm258_vm1, %v5488_v17  ;;  %v5696_v56 = vld [vmem:[%s5417_s27 + $0xda] sm:$0xff]  ;;  %v192_v57 = vld [vmem:[%s5417_s27 + $0x8] sm:$0xff]  ;;  %v5713_v60 = vld [vmem:[%s5417_s27 + $0xf2] sm:$0xff] }
  0x27   : > { %4611 = vmatprep.mubr.msk.f32.mxu1 %vm258_vm1, %v5477_v16  ;;  %4811 = vmatprep.mubr.msk.f32.mxu0 %vm258_vm1, %v5491_v18  ;;  %v5707_v58 = vld [vmem:[%s5417_s27 + $0xe2] sm:$0xff]  ;;  %v5710_v59 = vld [vmem:[%s5417_s27 + $0x18] sm:$0xff]  ;;  %v5736_v0 = vld [vmem:[%s5417_s27 + $0x30] sm:$0xff] }
  0x28   : > { %6471 = vst [vmem:[#allocation15_spill] sm:$0xff] %v5710_v59  ;;  %v5728_v62 = vld [vmem:[%s5417_s27 + $0x20] sm:$0xff]  ;;  %6473 = vst [vmem:[#allocation17_spill] sm:$0xff] %v5736_v0  ;;  %v5739_v2 = vld [vmem:[%s5417_s27 + $0x10a] sm:$0xff] }
  0x29   : > { %6472 = vst [vmem:[#allocation16_spill] sm:$0xff] %v5728_v62  ;;  %v5731_v63 = vld [vmem:[%s5417_s27 + $0xfa] sm:$0xff]  ;;  %v5755_v4 = vld [vmem:[%s5417_s27 + $0x112] sm:$0xff]  ;;  %v5758_v5 = vld [vmem:[%s5417_s27 + $0x48] sm:$0xff] }
  0x2a   : > { %4612 = vmatmul.mubr.msk.f32.gmra.mrb[10].mxu1 %vm258_vm1, %v5488_v17  ;;  %4812 = vmatmul.mubr.msk.f32.gmra.mrb[10].mxu0 %vm258_vm1, %v5502_v19  ;;  %v5752_v3 = vld [vmem:[%s5417_s27 + $0x38] sm:$0xff]  ;;  %6475 = vst [vmem:[#allocation19_spill] sm:$0xff] %v5758_v5  ;;  %v5761_v6 = vld [vmem:[%s5417_s27 + $0x122] sm:$0xff]  ;;  %v5772_v7 = vld [vmem:[%s5417_s27 + $0x50] sm:$0xff] }
  0x2b   : > { %4614 = vmatprep.mubr.msk.f32.mxu1 %vm258_vm1, %v5491_v18  ;;  %4814 = vmatprep.mubr.msk.f32.mxu0 %vm258_vm1, %v5505_v20  ;;  %6474 = vst [vmem:[#allocation18_spill] sm:$0xff] %v5752_v3  ;;  %6476 = vst [vmem:[#allocation20_spill] sm:$0xff] %v5772_v7 }
  0x2e   : > { %4615 = vmatmul.mubr.msk.f32.gmra.mrb[12].mxu1 %vm258_vm1, %v5502_v19  ;;  %4815 = vmatmul.mubr.msk.f32.gmra.mrb[12].mxu0 %vm258_vm1, %v5516_v21 }
  0x2f   : > { %4617 = vmatprep.mubr.msk.f32.mxu1 %vm258_vm1, %v5505_v20  ;;  %4817 = vmatprep.mubr.msk.f32.mxu0 %vm258_vm1, %v5519_v22 }
  0x32   : > { %4618 = vmatmul.mubr.msk.f32.gmra.mrb[14].mxu1 %vm258_vm1, %v5516_v21  ;;  %4818 = vmatmul.mubr.msk.f32.gmra.mrb[14].mxu0 %vm258_vm1, %v5530_v23 }
  0x33   : > { %4620 = vmatprep.mubr.msk.f32.mxu1 %vm258_vm1, %v5519_v22  ;;  %4846 = vmatprep.mubr.msk.f32.mxu0 %vm258_vm1, %v5533_v24 }
  0x36   : > { %4621 = vmatmul.mubr.msk.f32.gmra.mrb[16].mxu1 %vm258_vm1, %v5530_v23  ;;  %4847 = vmatmul.mubr.msk.f32.vlgmr.msra.gmra.mrb[0].mxu0 %vm258_vm1, %v5544_v25 }
  0x37   : > { %4895 = vmatpush3.msk.msra.mxu0 %vm355_vm0, %v4127_v9  ;;  %4623 = vmatprep.mubr.msk.f32.mxu1 %vm258_vm1, %v5547_v26  ;;  %v5775_v9 = vld [vmem:[%s5417_s27 + $0x12a] sm:$0xff] }
  0x38   : > { %4849 = vmatprep.mubr.msk.f32.mxu0 %vm258_vm1, %v5550_v27  ;;  %4944 = vmatprep.subr.msk.mxu0 %vm355_vm0, %v5555_v28 }
  0x3a   : > { %4624 = vmatmul.mubr.msk.f32.gmra.mrb[18].mxu1 %vm258_vm1, %v5565_v29  ;;  %4850 = vmatmul.mubr.msk.f32.gmra.mrb[2].mxu0 %vm258_vm1, %v5568_v30  ;;  %v5872_v29 = vld [vmem:[%s5417_s27 + $0xd8] sm:$0xff] }
  0x3b   : > { %4626 = vmatprep.mubr.msk.f32.mxu1 %vm258_vm1, %v5573_v31  ;;  %4852 = vmatprep.mubr.msk.f32.mxu0 %vm258_vm1, %v5576_v32  ;;  %v5855_v31 = vld [vmem:[%s5417_s27 + $0x18a] sm:$0xff] }
  0x3c   : > { %6487 = vst [vmem:[#allocation31_spill] sm:$0xff] %v5855_v31 }
  0x3e   : > { %4627 = vmatmul.mubr.msk.f32.gmra.mrb[20].mxu1 %vm258_vm1, %v5589_v33  ;;  %4853 = vmatmul.mubr.msk.f32.gmra.mrb[4].mxu0 %vm258_vm1, %v5592_v34  ;;  %v5841_v33 = vld [vmem:[%s5417_s27 + $0x182] sm:$0xff] }
  0x3f   : > { %4629 = vmatprep.mubr.msk.f32.mxu1 %vm258_vm1, %v5595_v35  ;;  %4855 = vmatprep.mubr.msk.f32.mxu0 %vm258_vm1, %v5598_v36  ;;  %v5838_v35 = vld [vmem:[%s5417_s27 + $0xa8] sm:$0xff]  ;;  %6485 = vst [vmem:[#allocation29_spill] sm:$0xff] %v5841_v33 }
  0x40   : > { %6484 = vst [vmem:[#allocation28_spill] sm:$0xff] %v5838_v35 }
  0x42   : > { %4630 = vmatmul.mubr.msk.f32.gmra.mrb[22].mxu1 %vm258_vm1, %v5609_v37  ;;  %4856 = vmatmul.mubr.msk.f32.gmra.mrb[6].mxu0 %vm258_vm1, %v5612_v38  ;;  %v5835_v37 = vld [vmem:[%s5417_s27 + $0x172] sm:$0xff] }
  0x43   : > { %4632 = vmatprep.mubr.msk.f32.mxu1 %vm258_vm1, %v5615_v39  ;;  %4858 = vmatprep.mubr.msk.f32.mxu0 %vm258_vm1, %v5618_v40  ;;  %v5832_v39 = vld [vmem:[%s5417_s27 + $0x98] sm:$0xff]  ;;  %6483 = vst [vmem:[#allocation27_spill] sm:$0xff] %v5835_v37 }
  0x44   : > { %6482 = vst [vmem:[#allocation26_spill] sm:$0xff] %v5832_v39 }
  0x46   : > { %4633 = vmatmul.mubr.msk.f32.gmra.mrb[24].mxu1 %vm258_vm1, %v5629_v41  ;;  %4859 = vmatmul.mubr.msk.f32.gmra.mrb[8].mxu0 %vm258_vm1, %v5632_v42  ;;  %v5821_v41 = vld [vmem:[%s5417_s27 + $0x16a] sm:$0xff] }
  0x47   : > { %4635 = vmatprep.mubr.msk.f32.mxu1 %vm258_vm1, %v5635_v43  ;;  %4861 = vmatprep.mubr.msk.f32.mxu0 %vm258_vm1, %v5638_v44  ;;  %v5818_v43 = vld [vmem:[%s5417_s27 + $0x90] sm:$0xff] }
  0x48   : > { %6481 = vst [vmem:[#allocation25_spill] sm:$0xff] %v5818_v43 }
  0x4a   : > { %4636 = vmatmul.mubr.msk.f32.gmra.mrb[26].mxu1 %vm258_vm1, %v5649_v45  ;;  %4862 = vmatmul.mubr.msk.f32.gmra.mrb[10].mxu0 %vm258_vm1, %v5652_v46  ;;  %v5815_v45 = vld [vmem:[%s5417_s27 + $0x15a] sm:$0xff] }
  0x4b   : > { %4638 = vmatprep.mubr.msk.f32.mxu1 %vm258_vm1, %v5655_v47  ;;  %4864 = vmatprep.mubr.msk.f32.mxu0 %vm258_vm1, %v5658_v48  ;;  %v5812_v47 = vld [vmem:[%s5417_s27 + $0x80] sm:$0xff] }
  0x4c   : > { %6480 = vst [vmem:[#allocation24_spill] sm:$0xff] %v5812_v47 }
  0x4e   : > { %4639 = vmatmul.mubr.msk.f32.gmra.mrb[28].mxu1 %vm258_vm1, %v5669_v49  ;;  %4865 = vmatmul.mubr.msk.f32.gmra.mrb[12].mxu0 %vm258_vm1, %v5672_v50  ;;  %v5801_v49 = vld [vmem:[%s5417_s27 + $0x152] sm:$0xff] }
  0x4f   : > { %4641 = vmatprep.mubr.msk.f32.mxu1 %vm258_vm1, %v5675_v51  ;;  %4867 = vmatprep.mubr.msk.f32.mxu0 %vm258_vm1, %v5678_v52  ;;  %v5798_v51 = vld [vmem:[%s5417_s27 + $0x78] sm:$0xff] }
  0x50   : > { %6479 = vst [vmem:[#allocation23_spill] sm:$0xff] %v5798_v51 }
  0x52   : > { %4642 = vmatmul.mubr.msk.f32.gmra.mrb[30].mxu1 %vm258_vm1, %v5689_v53  ;;  %4868 = vmatmul.mubr.msk.f32.gmra.mrb[14].mxu0 %vm258_vm1, %v5692_v54  ;;  %v5795_v53 = vld [vmem:[%s5417_s27 + $0x142] sm:$0xff] }
  0x53   : > { %4646 = vmatprep.mubr.msk.f32.mxu1 %vm258_vm1, %v191_v55  ;;  %4870 = vmatprep.mubr.msk.f32.mxu0 %vm258_vm1, %v5696_v56  ;;  %v5781_v55 = vld [vmem:[%s5417_s27 + $0x13a] sm:$0xff] }
  0x56   : > { %4647 = vmatmul.mubr.msk.f32.vlgmr.msra.gmra.mrb[0].mxu1 %vm258_vm1, %v192_v57  ;;  %4871 = vmatmul.mubr.msk.f32.gmra.mrb[16].mxu0 %vm258_vm1, %v5707_v58  ;;  %v5792_v57 = vld [vmem:[%s5417_s27 + $0x68] sm:$0xff] }
  0x57   : > { %4695 = vmatpush3.msk.msra.mxu1 %vm355_vm0, %v5436_v10  ;;  %4649 = vmatprep.mubr.msk.f32.mxu1 %vm258_vm1, %v5710_v59  ;;  %v5778_v10 = vld [vmem:[%s5417_s27 + $0x60] sm:$0xff]  ;;  %6478 = vst [vmem:[#allocation22_spill] sm:$0xff] %v5792_v57 }
  0x58   : > { %4873 = vmatprep.mubr.msk.f32.mxu0 %vm258_vm1, %v5713_v60  ;;  %4744 = vmatprep.subr.msk.mxu1 %vm355_vm0, %v5718_v61  ;;  %6477 = vst [vmem:[#allocation21_spill] sm:$0xff] %v5778_v10  ;;  %v5858_v59 = vld [vmem:[%s5417_s27 + $0xc0] sm:$0xff] }
  0x5a   : > { %4650 = vmatmul.mubr.msk.f32.gmra.mrb[2].mxu1 %vm258_vm1, %v5728_v62  ;;  %4874 = vmatmul.mubr.msk.f32.gmra.mrb[18].mxu0 %vm258_vm1, %v5731_v63  ;;  %v5852_v62 = vld [vmem:[%s5417_s27 + $0xb0] sm:$0xff] }
  0x5b   : > { %4652 = vmatprep.mubr.msk.f32.mxu1 %vm258_vm1, %v5736_v0  ;;  %4876 = vmatprep.mubr.msk.f32.mxu0 %vm258_vm1, %v5739_v2  ;;  %6486 = vst [vmem:[#allocation30_spill] sm:$0xff] %v5852_v62 }
  0x5e   : > { %4653 = vmatmul.mubr.msk.f32.gmra.mrb[4].mxu1 %vm258_vm1, %v5752_v3  ;;  %4877 = vmatmul.mubr.msk.f32.gmra.mrb[20].mxu0 %vm258_vm1, %v5755_v4 }
  0x5f   : > { %4655 = vmatprep.mubr.msk.f32.mxu1 %vm258_vm1, %v5758_v5  ;;  %4879 = vmatprep.mubr.msk.f32.mxu0 %vm258_vm1, %v5761_v6 }
  0x62   : > { %4656 = vmatmul.mubr.msk.f32.gmra.mrb[6].mxu1 %vm258_vm1, %v5772_v7  ;;  %4880 = vmatmul.mubr.msk.f32.gmra.mrb[22].mxu0 %vm258_vm1, %v5775_v9 }
  0x63   : > { %4658 = vmatprep.mubr.msk.f32.mxu1 %vm258_vm1, %v5778_v10  ;;  %4882 = vmatprep.mubr.msk.f32.mxu0 %vm258_vm1, %v5781_v55 }
  0x66   : > { %4659 = vmatmul.mubr.msk.f32.gmra.mrb[8].mxu1 %vm258_vm1, %v5792_v57  ;;  %4883 = vmatmul.mubr.msk.f32.gmra.mrb[24].mxu0 %vm258_vm1, %v5795_v53 }
  0x67   : > { %4661 = vmatprep.mubr.msk.f32.mxu1 %vm258_vm1, %v5798_v51  ;;  %4885 = vmatprep.mubr.msk.f32.mxu0 %vm258_vm1, %v5801_v49 }
  0x6a   : > { %4662 = vmatmul.mubr.msk.f32.gmra.mrb[10].mxu1 %vm258_vm1, %v5812_v47  ;;  %4886 = vmatmul.mubr.msk.f32.gmra.mrb[26].mxu0 %vm258_vm1, %v5815_v45 }
  0x6b   : > { %4664 = vmatprep.mubr.msk.f32.mxu1 %vm258_vm1, %v5818_v43  ;;  %4888 = vmatprep.mubr.msk.f32.mxu0 %vm258_vm1, %v5821_v41 }
  0x6e   : > { %4665 = vmatmul.mubr.msk.f32.gmra.mrb[12].mxu1 %vm258_vm1, %v5832_v39  ;;  %4889 = vmatmul.mubr.msk.f32.gmra.mrb[28].mxu0 %vm258_vm1, %v5835_v37  ;;  %v5877_v37 = vld [vmem:[%s6410_s1 + $0x20] sm:$0xf] }
  0x6f   : > { %4667 = vmatprep.mubr.msk.f32.mxu1 %vm258_vm1, %v5838_v35  ;;  %4891 = vmatprep.mubr.msk.f32.mxu0 %vm258_vm1, %v5841_v33  ;;  %v5869_v33 = vld [vmem:[%s5417_s27 + $0xc8] sm:$0xff] }
  0x70   : > { %6488 = vst [vmem:[#allocation32_spill] sm:$0xff] %v5869_v33 }
  0x72   : > { %4668 = vmatmul.mubr.msk.f32.gmra.mrb[14].mxu1 %vm258_vm1, %v5852_v62  ;;  %4892 = vmatmul.mubr.msk.f32.gmra.mrb[30].mxu0 %vm258_vm1, %v5855_v31  ;;  %v5888_v31 = vld [vmem:[%s5417_s27 + $0xe0] sm:$0xff] }
  0x73   : > { %4670 = vmatprep.mubr.msk.f32.mxu1 %vm258_vm1, %v5858_v59  ;;  %4896 = vmatprep.mubr.msk.f32.mxu0 %vm258_vm1, %v5736_v0  ;;  %v5893_v0 = vld [vmem:[%s5417_s27 + $0xf0] sm:$0xff] }
  0x76   : > { %4671 = vmatmul.mubr.msk.f32.gmra.mrb[16].mxu1 %vm258_vm1, %v5869_v33  ;;  %4897 = vmatmul.mubr.msk.f32.vlgmr.msra.gmra.mrb[0].mxu0 %vm258_vm1, %v5752_v3  ;;  %v908_v3 = vld [vmem:[%s5417_s27 + $0x2] sm:$0xff] }
  0x77   : > { %4945 = vmatpush3.msk.msra.mxu0 %vm355_vm0, %v5555_v28  ;;  %4673 = vmatprep.mubr.msk.f32.mxu1 %vm258_vm1, %v5872_v29  ;;  %v5906_v28 = vld [vmem:[%s5417_s27 + $0xf8] sm:$0xff] }
  0x78   : > { %4899 = vmatprep.mubr.msk.f32.mxu0 %vm258_vm1, %v5758_v5  ;;  %4994 = vmatprep.subr.msk.mxu0 %vm355_vm0, %v5877_v37  ;;  %v5909_v5 = vld [vmem:[%s5417_s27 + $0x108] sm:$0xff] }
  0x7a   : > { %4674 = vmatmul.mubr.msk.f32.gmra.mrb[18].mxu1 %vm258_vm1, %v5888_v31  ;;  %4900 = vmatmul.mubr.msk.f32.gmra.mrb[2].mxu0 %vm258_vm1, %v5772_v7  ;;  %v5920_v7 = vld [vmem:[%s5417_s27 + $0x110] sm:$0xff] }
  0x7b   : > { %4676 = vmatprep.mubr.msk.f32.mxu1 %vm258_vm1, %v5893_v0  ;;  %4902 = vmatprep.mubr.msk.f32.mxu0 %vm258_vm1, %v5778_v10  ;;  %v5923_v10 = vld [vmem:[%s5417_s27 + $0x120] sm:$0xff] }
  0x7e   : > { %4677 = vmatmul.mubr.msk.f32.gmra.mrb[20].mxu1 %vm258_vm1, %v5906_v28  ;;  %4903 = vmatmul.mubr.msk.f32.gmra.mrb[4].mxu0 %vm258_vm1, %v5792_v57  ;;  %v5934_v57 = vld [vmem:[%s5417_s27 + $0x128] sm:$0xff] }
  0x7f   : > { %4679 = vmatprep.mubr.msk.f32.mxu1 %vm258_vm1, %v5909_v5  ;;  %4905 = vmatprep.mubr.msk.f32.mxu0 %vm258_vm1, %v5798_v51  ;;  %v5937_v51 = vld [vmem:[%s5417_s27 + $0x138] sm:$0xff] }
  0x82   : > { %4680 = vmatmul.mubr.msk.f32.gmra.mrb[22].mxu1 %vm258_vm1, %v5920_v7  ;;  %4906 = vmatmul.mubr.msk.f32.gmra.mrb[6].mxu0 %vm258_vm1, %v5812_v47  ;;  %v5948_v47 = vld [vmem:[%s5417_s27 + $0x140] sm:$0xff] }
  0x83   : > { %4682 = vmatprep.mubr.msk.f32.mxu1 %vm258_vm1, %v5923_v10  ;;  %4908 = vmatprep.mubr.msk.f32.mxu0 %vm258_vm1, %v5818_v43  ;;  %v5951_v43 = vld [vmem:[%s5417_s27 + $0x150] sm:$0xff] }
  0x86   : > { %4683 = vmatmul.mubr.msk.f32.gmra.mrb[24].mxu1 %vm258_vm1, %v5934_v57  ;;  %4909 = vmatmul.mubr.msk.f32.gmra.mrb[8].mxu0 %vm258_vm1, %v5832_v39  ;;  %v5962_v39 = vld [vmem:[%s5417_s27 + $0x158] sm:$0xff] }
  0x87   : > { %4685 = vmatprep.mubr.msk.f32.mxu1 %vm258_vm1, %v5937_v51  ;;  %4911 = vmatprep.mubr.msk.f32.mxu0 %vm258_vm1, %v5838_v35  ;;  %v5965_v35 = vld [vmem:[%s5417_s27 + $0x168] sm:$0xff] }
  0x8a   : > { %4686 = vmatmul.mubr.msk.f32.gmra.mrb[26].mxu1 %vm258_vm1, %v5948_v47  ;;  %4912 = vmatmul.mubr.msk.f32.gmra.mrb[10].mxu0 %vm258_vm1, %v5852_v62  ;;  %v5976_v62 = vld [vmem:[%s5417_s27 + $0x170] sm:$0xff] }
  0x8b   : > { %4688 = vmatprep.mubr.msk.f32.mxu1 %vm258_vm1, %v5951_v43  ;;  %4914 = vmatprep.mubr.msk.f32.mxu0 %vm258_vm1, %v5858_v59 }
  0x8e   : > { %4689 = vmatmul.mubr.msk.f32.gmra.mrb[28].mxu1 %vm258_vm1, %v5962_v39  ;;  %4915 = vmatmul.mubr.msk.f32.gmra.mrb[12].mxu0 %vm258_vm1, %v5869_v33  ;;  %v909_v33 = vld [vmem:[%s5417_s27 + $0xa] sm:$0xff] }
  0x8f   : > { %4691 = vmatprep.mubr.msk.f32.mxu1 %vm258_vm1, %v5965_v35  ;;  %4917 = vmatprep.mubr.msk.f32.mxu0 %vm258_vm1, %v5872_v29 }
  0x92   : > { %4692 = vmatmul.mubr.msk.f32.gmra.mrb[30].mxu1 %vm258_vm1, %v5976_v62  ;;  %4918 = vmatmul.mubr.msk.f32.gmra.mrb[14].mxu0 %vm258_vm1, %v5888_v31 }
  0x93   : > { %4696 = vmatprep.mubr.msk.f32.mxu1 %vm258_vm1, %v908_v3  ;;  %4920 = vmatprep.mubr.msk.f32.mxu0 %vm258_vm1, %v5893_v0  ;;  %v6505_v3 = vld [vmem:[#allocation22_spill] sm:$0xff] }
  0x96   : > { %4697 = vmatmul.mubr.msk.f32.vlgmr.msra.gmra.mrb[0].mxu1 %vm258_vm1, %v909_v33  ;;  %4921 = vmatmul.mubr.msk.f32.gmra.mrb[16].mxu0 %vm258_vm1, %v5906_v28  ;;  %v4125_v33 = vld [vmem:[%s5417_s27 + $0x198] sm:$0xff] }
  0x97   : > { %4745 = vmatpush3.msk.msra.mxu1 %vm355_vm0, %v5718_v61  ;;  %4699 = vmatprep.mubr.msk.f32.mxu1 %vm258_vm1, %v5533_v24  ;;  %v6031_v24 = vld [vmem:[%s5417_s27 + $0x180] sm:$0xff] }
  0x98   : > { %4923 = vmatprep.mubr.msk.f32.mxu0 %vm258_vm1, %v5909_v5  ;;  %5044 = vmatprep.subr.msk.mxu1 %vm355_vm0, %v5395_v1  ;;  %v4126_v61 = vld [vmem:[%s5417_s27 + $0x1a0] sm:$0xff] }
  0x9a   : > { %4700 = vmatmul.mubr.msk.f32.gmra.mrb[2].mxu1 %vm258_vm1, %v5544_v25  ;;  %4924 = vmatmul.mubr.msk.f32.gmra.mrb[18].mxu0 %vm258_vm1, %v5920_v7  ;;  %v6042_v25 = vld [vmem:[%s5417_s27 + $0x188] sm:$0xff] }
  0x9b   : > { %4702 = vmatprep.mubr.msk.f32.mxu1 %vm258_vm1, %v5550_v27  ;;  %4926 = vmatprep.mubr.msk.f32.mxu0 %vm258_vm1, %v5923_v10 }
  0x9e   : > { %4703 = vmatmul.mubr.msk.f32.gmra.mrb[4].mxu1 %vm258_vm1, %v5568_v30  ;;  %4927 = vmatmul.mubr.msk.f32.gmra.mrb[20].mxu0 %vm258_vm1, %v5934_v57 }
  0x9f   : > { %4705 = vmatprep.mubr.msk.f32.mxu1 %vm258_vm1, %v5576_v32  ;;  %4929 = vmatprep.mubr.msk.f32.mxu0 %vm258_vm1, %v5937_v51 }
  0xa2   : > { %4706 = vmatmul.mubr.msk.f32.gmra.mrb[6].mxu1 %vm258_vm1, %v5592_v34  ;;  %4930 = vmatmul.mubr.msk.f32.gmra.mrb[22].mxu0 %vm258_vm1, %v5948_v47 }
  0xa3   : > { %4708 = vmatprep.mubr.msk.f32.mxu1 %vm258_vm1, %v5598_v36  ;;  %4932 = vmatprep.mubr.msk.f32.mxu0 %vm258_vm1, %v5951_v43 }
  0xa6   : > { %4709 = vmatmul.mubr.msk.f32.gmra.mrb[8].mxu1 %vm258_vm1, %v5612_v38  ;;  %4933 = vmatmul.mubr.msk.f32.gmra.mrb[24].mxu0 %vm258_vm1, %v5962_v39 }
  0xa7   : > { %4711 = vmatprep.mubr.msk.f32.mxu1 %vm258_vm1, %v5618_v40  ;;  %4935 = vmatprep.mubr.msk.f32.mxu0 %vm258_vm1, %v5965_v35 }
  0xaa   : > { %4712 = vmatmul.mubr.msk.f32.gmra.mrb[10].mxu1 %vm258_vm1, %v5632_v42  ;;  %4936 = vmatmul.mubr.msk.f32.gmra.mrb[26].mxu0 %vm258_vm1, %v5976_v62 }
  0xab   : > { %4714 = vmatprep.mubr.msk.f32.mxu1 %vm258_vm1, %v5638_v44  ;;  %4938 = vmatprep.mubr.msk.f32.mxu0 %vm258_vm1, %v6031_v24 }
  0xae   : > { %4715 = vmatmul.mubr.msk.f32.gmra.mrb[12].mxu1 %vm258_vm1, %v5652_v46  ;;  %4939 = vmatmul.mubr.msk.f32.gmra.mrb[28].mxu0 %vm258_vm1, %v6042_v25 }
  0xaf   : > { %4717 = vmatprep.mubr.msk.f32.mxu1 %vm258_vm1, %v5658_v48  ;;  %4941 = vmatprep.mubr.msk.f32.mxu0 %vm258_vm1, %v4125_v33  ;;  %v6506_v33 = vld [vmem:[#allocation10_spill] sm:$0xff] }
  0xb2   : > { %4718 = vmatmul.mubr.msk.f32.gmra.mrb[14].mxu1 %vm258_vm1, %v5672_v50  ;;  %4942 = vmatmul.mubr.msk.f32.gmra.mrb[30].mxu0 %vm258_vm1, %v4126_v61  ;;  %v6507_v61 = vld [vmem:[#allocation23_spill] sm:$0xff] }
  0xb3   : > { %4720 = vmatprep.mubr.msk.f32.mxu1 %vm258_vm1, %v5678_v52  ;;  %4946 = vmatprep.mubr.msk.f32.mxu0 %vm258_vm1, %v5426_v8  ;;  %v6489_v8 = vld [vmem:[#allocation27_spill] sm:$0xff] }
  0xb6   : > { %4721 = vmatmul.mubr.msk.f32.gmra.mrb[16].mxu1 %vm258_vm1, %v5692_v54  ;;  %4947 = vmatmul.mubr.msk.f32.vlgmr.msra.gmra.mrb[0].mxu0 %vm258_vm1, %v5441_v11  ;;  %v6490_v11 = vld [vmem:[#allocation2_spill] sm:$0xff] }
  0xb7   : > { %4995 = vmatpush3.msk.msra.mxu0 %vm355_vm0, %v5877_v37  ;;  %4723 = vmatprep.mubr.msk.f32.mxu1 %vm258_vm1, %v5696_v56  ;;  %v6504_v37 = vld [vmem:[#allocation9_spill] sm:$0xff] }
  0xb8   : > { %4949 = vmatprep.mubr.msk.f32.mxu0 %vm258_vm1, %v5447_v12  ;;  %v6491_v12 = vld [vmem:[#allocation15_spill] sm:$0xff] }
  0xba   : > { %4724 = vmatmul.mubr.msk.f32.gmra.mrb[18].mxu1 %vm258_vm1, %v5707_v58  ;;  %4950 = vmatmul.mubr.msk.f32.gmra.mrb[2].mxu0 %vm258_vm1, %v5460_v13  ;;  %v6492_v13 = vld [vmem:[#allocation3_spill] sm:$0xff] }
  0xbb   : > { %4726 = vmatprep.mubr.msk.f32.mxu1 %vm258_vm1, %v5713_v60  ;;  %4952 = vmatprep.mubr.msk.f32.mxu0 %vm258_vm1, %v5463_v14  ;;  %v6493_v14 = vld [vmem:[#allocation16_spill] sm:$0xff] }
  0xbe   : > { %4727 = vmatmul.mubr.msk.f32.gmra.mrb[20].mxu1 %vm258_vm1, %v5731_v63  ;;  %4953 = vmatmul.mubr.msk.f32.gmra.mrb[4].mxu0 %vm258_vm1, %v5474_v15  ;;  %v6494_v15 = vld [vmem:[#allocation4_spill] sm:$0xff] }
  0xbf   : > { %4729 = vmatprep.mubr.msk.f32.mxu1 %vm258_vm1, %v5739_v2  ;;  %4955 = vmatprep.mubr.msk.f32.mxu0 %vm258_vm1, %v5477_v16  ;;  %v6495_v16 = vld [vmem:[#allocation17_spill] sm:$0xff] }
  0xc2   : > { %4730 = vmatmul.mubr.msk.f32.gmra.mrb[22].mxu1 %vm258_vm1, %v5755_v4  ;;  %4956 = vmatmul.mubr.msk.f32.gmra.mrb[6].mxu0 %vm258_vm1, %v5488_v17  ;;  %v6496_v17 = vld [vmem:[#allocation5_spill] sm:$0xff] }
  0xc3   : > { %4732 = vmatprep.mubr.msk.f32.mxu1 %vm258_vm1, %v5761_v6  ;;  %4958 = vmatprep.mubr.msk.f32.mxu0 %vm258_vm1, %v5491_v18  ;;  %v6497_v18 = vld [vmem:[#allocation18_spill] sm:$0xff] }
  0xc6   : > { %4733 = vmatmul.mubr.msk.f32.gmra.mrb[24].mxu1 %vm258_vm1, %v5775_v9  ;;  %4959 = vmatmul.mubr.msk.f32.gmra.mrb[8].mxu0 %vm258_vm1, %v5502_v19  ;;  %v6498_v19 = vld [vmem:[#allocation6_spill] sm:$0xff] }
  0xc7   : > { %4735 = vmatprep.mubr.msk.f32.mxu1 %vm258_vm1, %v5781_v55  ;;  %4961 = vmatprep.mubr.msk.f32.mxu0 %vm258_vm1, %v5505_v20  ;;  %v6499_v20 = vld [vmem:[#allocation19_spill] sm:$0xff] }
  0xca   : > { %4736 = vmatmul.mubr.msk.f32.gmra.mrb[26].mxu1 %vm258_vm1, %v5795_v53  ;;  %4962 = vmatmul.mubr.msk.f32.gmra.mrb[10].mxu0 %vm258_vm1, %v5516_v21  ;;  %v6500_v21 = vld [vmem:[#allocation7_spill] sm:$0xff] }
  0xcb   : > { %4738 = vmatprep.mubr.msk.f32.mxu1 %vm258_vm1, %v5801_v49  ;;  %4964 = vmatprep.mubr.msk.f32.mxu0 %vm258_vm1, %v5519_v22  ;;  %v6502_v22 = vld [vmem:[#allocation8_spill] sm:$0xff] }
  0xce   : > { %4739 = vmatmul.mubr.msk.f32.gmra.mrb[28].mxu1 %vm258_vm1, %v5815_v45  ;;  %4965 = vmatmul.mubr.msk.f32.gmra.mrb[12].mxu0 %vm258_vm1, %v5530_v23  ;;  %v6503_v23 = vld [vmem:[#allocation21_spill] sm:$0xff] }
  0xcf   : > { %4741 = vmatprep.mubr.msk.f32.mxu1 %vm258_vm1, %v5821_v41  ;;  %4967 = vmatprep.mubr.msk.f32.mxu0 %vm258_vm1, %v5547_v26 }
  0xd2   : > { %4742 = vmatmul.mubr.msk.f32.gmra.mrb[30].mxu1 %vm258_vm1, %v6489_v8  ;;  %4968 = vmatmul.mubr.msk.f32.gmra.mrb[14].mxu0 %vm258_vm1, %v6490_v11  ;;  %v6516_v8 = vld [vmem:[#allocation30_spill] sm:$0xff] }
  0xd3   : > { %4746 = vmatprep.mubr.msk.f32.mxu1 %vm258_vm1, %v6491_v12  ;;  %4970 = vmatprep.mubr.msk.f32.mxu0 %vm258_vm1, %v6492_v13  ;;  %v6508_v12 = vld [vmem:[#allocation11_spill] sm:$0xff] }
  0xd6   : > { %4747 = vmatmul.mubr.msk.f32.vlgmr.msra.gmra.mrb[0].mxu1 %vm258_vm1, %v6493_v14  ;;  %4971 = vmatmul.mubr.msk.f32.gmra.mrb[16].mxu0 %vm258_vm1, %v6494_v15  ;;  %v6509_v14 = vld [vmem:[#allocation24_spill] sm:$0xff] }
  0xd7   : > { %5045 = vmatpush3.msk.msra.mxu1 %vm355_vm0, %v5395_v1  ;;  %4749 = vmatprep.mubr.msk.f32.mxu1 %vm258_vm1, %v6495_v16  ;;  %v6501_v1 = vld [vmem:[#allocation20_spill] sm:$0xff] }
  0xd8   : > { %4973 = vmatprep.mubr.msk.f32.mxu0 %vm258_vm1, %v6496_v17  ;;  %v6510_v16 = vld [vmem:[#allocation12_spill] sm:$0xff] }
  0xda   : > { %4750 = vmatmul.mubr.msk.f32.gmra.mrb[2].mxu1 %vm258_vm1, %v6497_v18  ;;  %4974 = vmatmul.mubr.msk.f32.gmra.mrb[18].mxu0 %vm258_vm1, %v6498_v19  ;;  %v6511_v18 = vld [vmem:[#allocation25_spill] sm:$0xff] }
  0xdb   : > { %4752 = vmatprep.mubr.msk.f32.mxu1 %vm258_vm1, %v6499_v20  ;;  %4976 = vmatprep.mubr.msk.f32.mxu0 %vm258_vm1, %v6500_v21  ;;  %v6512_v20 = vld [vmem:[#allocation13_spill] sm:$0xff] }
  0xde   : > { %4753 = vmatmul.mubr.msk.f32.gmra.mrb[4].mxu1 %vm258_vm1, %v6501_v1  ;;  %4977 = vmatmul.mubr.msk.f32.gmra.mrb[20].mxu0 %vm258_vm1, %v6502_v22  ;;  %v6169_v1 = vld [vmem:[%s5417_s27 + $0x181] sm:$0xff] }
  0xdf   : > { %4755 = vmatprep.mubr.msk.f32.mxu1 %vm258_vm1, %v6503_v23  ;;  %4979 = vmatprep.mubr.msk.f32.mxu0 %vm258_vm1, %v6504_v37  ;;  %v6513_v23 = vld [vmem:[#allocation26_spill] sm:$0xff] }
  0xe2   : > { %4756 = vmatmul.mubr.msk.f32.gmra.mrb[6].mxu1 %vm258_vm1, %v6505_v3  ;;  %4980 = vmatmul.mubr.msk.f32.gmra.mrb[22].mxu0 %vm258_vm1, %v6506_v33  ;;  %v6514_v3 = vld [vmem:[#allocation14_spill] sm:$0xff] }
  0xe3   : > { %4758 = vmatprep.mubr.msk.f32.mxu1 %vm258_vm1, %v6507_v61  ;;  %4982 = vmatprep.mubr.msk.f32.mxu0 %vm258_vm1, %v6508_v12  ;;  %v6515_v61 = vld [vmem:[#allocation28_spill] sm:$0xff] }
  0xe6   : > { %4759 = vmatmul.mubr.msk.f32.gmra.mrb[8].mxu1 %vm258_vm1, %v6509_v14  ;;  %4983 = vmatmul.mubr.msk.f32.gmra.mrb[24].mxu0 %vm258_vm1, %v6510_v16  ;;  %v6180_v14 = vld [vmem:[%s5417_s27 + $0x189] sm:$0xff] }
  0xe7   : > { %4761 = vmatprep.mubr.msk.f32.mxu1 %vm258_vm1, %v6511_v18  ;;  %4985 = vmatprep.mubr.msk.f32.mxu0 %vm258_vm1, %v6512_v20  ;;  %v4191_v18 = vld [vmem:[%s5417_s27 + $0x199] sm:$0xff] }
  0xea   : > { %4762 = vmatmul.mubr.msk.f32.gmra.mrb[10].mxu1 %vm258_vm1, %v6513_v23  ;;  %4986 = vmatmul.mubr.msk.f32.gmra.mrb[26].mxu0 %vm258_vm1, %v6514_v3  ;;  %v4192_v23 = vld [vmem:[%s5417_s27 + $0x1a1] sm:$0xff]  ;;  %v6517_v3 = vld [vmem:[#allocation32_spill] sm:$0xff] }
  0xeb   : > { %4764 = vmatprep.mubr.msk.f32.mxu1 %vm258_vm1, %v6515_v61  ;;  %4988 = vmatprep.mubr.msk.f32.mxu0 %vm258_vm1, %v6169_v1 }
  0xee   : > { %4765 = vmatmul.mubr.msk.f32.gmra.mrb[12].mxu1 %vm258_vm1, %v6516_v8  ;;  %4989 = vmatmul.mubr.msk.f32.gmra.mrb[28].mxu0 %vm258_vm1, %v6180_v14 }
  0xef   : > { %4767 = vmatprep.mubr.msk.f32.mxu1 %vm258_vm1, %v5858_v59  ;;  %4991 = vmatprep.mubr.msk.f32.mxu0 %vm258_vm1, %v4191_v18 }
  0xf2   : > { %4768 = vmatmul.mubr.msk.f32.gmra.mrb[14].mxu1 %vm258_vm1, %v6517_v3  ;;  %4992 = vmatmul.mubr.msk.f32.gmra.mrb[30].mxu0 %vm258_vm1, %v4192_v23 }
  0xf3   : > { %4770 = vmatprep.mubr.msk.f32.mxu1 %vm258_vm1, %v5872_v29  ;;  %4996 = vmatprep.mubr.msk.f32.mxu0 %vm258_vm1, %v5550_v27  ;;  %v6519_v27 = vld [vmem:[#allocation29_spill] sm:$0xff] }
  0xf4   : > { %v4257_v29 = vld [vmem:[%s5417_s27 + $0x19a] sm:$0xff] }
  0xf6   : > { %4771 = vmatmul.mubr.msk.f32.gmra.mrb[16].mxu1 %vm258_vm1, %v5888_v31  ;;  %4997 = vmatmul.mubr.msk.f32.vlgmr.msra.gmra.mrb[0].mxu0 %vm258_vm1, %v5568_v30  ;;  %v6520_v30 = vld [vmem:[#allocation14_spill] sm:$0xff]  ;;  %v6521_v31 = vld [vmem:[#allocation31_spill] sm:$0xff] }
  0xf7   : > { %4773 = vmatprep.mubr.msk.f32.mxu1 %vm258_vm1, %v5893_v0  ;;  %4999 = vmatprep.mubr.msk.f32.mxu0 %vm258_vm1, %v5576_v32  ;;  %v4258_v32 = vld [vmem:[%s5417_s27 + $0x1a2] sm:$0xff] }
  0xfa   : > { %4774 = vmatmul.mubr.msk.f32.gmra.mrb[18].mxu1 %vm258_vm1, %v5906_v28  ;;  %5000 = vmatmul.mubr.msk.f32.gmra.mrb[2].mxu0 %vm258_vm1, %v5592_v34 }
  0xfb   : > { %4776 = vmatprep.mubr.msk.f32.mxu1 %vm258_vm1, %v5909_v5  ;;  %5002 = vmatprep.mubr.msk.f32.mxu0 %vm258_vm1, %v5598_v36 }
  0xfe   : > { %4777 = vmatmul.mubr.msk.f32.gmra.mrb[20].mxu1 %vm258_vm1, %v5920_v7  ;;  %5003 = vmatmul.mubr.msk.f32.gmra.mrb[4].mxu0 %vm258_vm1, %v5612_v38 }
  0xff   : > { %4779 = vmatprep.mubr.msk.f32.mxu1 %vm258_vm1, %v5923_v10  ;;  %5005 = vmatprep.mubr.msk.f32.mxu0 %vm258_vm1, %v5618_v40 }
 0x102   : > { %4780 = vmatmul.mubr.msk.f32.gmra.mrb[22].mxu1 %vm258_vm1, %v5934_v57  ;;  %5006 = vmatmul.mubr.msk.f32.gmra.mrb[6].mxu0 %vm258_vm1, %v5632_v42 }
 0x103   : > { %4782 = vmatprep.mubr.msk.f32.mxu1 %vm258_vm1, %v5937_v51  ;;  %5008 = vmatprep.mubr.msk.f32.mxu0 %vm258_vm1, %v5638_v44 }
 0x106   : > { %4783 = vmatmul.mubr.msk.f32.gmra.mrb[24].mxu1 %vm258_vm1, %v5948_v47  ;;  %5009 = vmatmul.mubr.msk.f32.gmra.mrb[8].mxu0 %vm258_vm1, %v5652_v46 }
 0x107   : > { %4785 = vmatprep.mubr.msk.f32.mxu1 %vm258_vm1, %v5951_v43  ;;  %5011 = vmatprep.mubr.msk.f32.mxu0 %vm258_vm1, %v5658_v48 }
 0x10a   : > { %4786 = vmatmul.mubr.msk.f32.gmra.mrb[26].mxu1 %vm258_vm1, %v5962_v39  ;;  %5012 = vmatmul.mubr.msk.f32.gmra.mrb[10].mxu0 %vm258_vm1, %v5672_v50 }
 0x10b   : > { %4788 = vmatprep.mubr.msk.f32.mxu1 %vm258_vm1, %v5965_v35  ;;  %5014 = vmatprep.mubr.msk.f32.mxu0 %vm258_vm1, %v5678_v52  ;;  %v6328_v52 = vld [vmem:[%s6411_s2] ss:$0 sm:$0xff] }
 0x10e   : > { %4789 = vmatmul.mubr.msk.f32.gmra.mrb[28].mxu1 %vm258_vm1, %v5976_v62  ;;  %5015 = vmatmul.mubr.msk.f32.gmra.mrb[12].mxu0 %vm258_vm1, %v5692_v54 }
 0x10f   : > { %4791 = vmatprep.mubr.msk.f32.mxu1 %vm258_vm1, %v6031_v24  ;;  %5017 = vmatprep.mubr.msk.f32.mxu0 %vm258_vm1, %v5696_v56 }
 0x112   : > { %4792 = vmatmul.mubr.msk.f32.gmra.mrb[30].mxu1 %vm258_vm1, %v6042_v25  ;;  %5018 = vmatmul.mubr.msk.f32.gmra.mrb[14].mxu0 %vm258_vm1, %v5707_v58 }
 0x113   : > { %4820 = vmatprep.mubr.msk.f32.mxu1 %vm258_vm1, %v5547_v26  ;;  %5020 = vmatprep.mubr.msk.f32.mxu0 %vm258_vm1, %v5713_v60  ;;  %v6518_v26 = vld [vmem:[#allocation27_spill] sm:$0xff] }
 0x116   : > { %4821 = vmatmul.mubr.msk.f32.vlgmr.msra.gmra.mrb[16].mxu1 %vm258_vm1, %v6490_v11  ;;  %5021 = vmatmul.mubr.msk.f32.gmra.mrb[16].mxu0 %vm258_vm1, %v5731_v63 }
 0x117   : > { %4823 = vmatprep.mubr.msk.f32.mxu1 %vm258_vm1, %v6492_v13  ;;  %5023 = vmatprep.mubr.msk.f32.mxu0 %vm258_vm1, %v5739_v2 }
 0x11a   : > { %4824 = vmatmul.mubr.msk.f32.gmra.mrb[18].mxu1 %vm258_vm1, %v6494_v15  ;;  %5024 = vmatmul.mubr.msk.f32.gmra.mrb[18].mxu0 %vm258_vm1, %v5755_v4 }
 0x11b   : > { %4826 = vmatprep.mubr.msk.f32.mxu1 %vm258_vm1, %v6496_v17  ;;  %5026 = vmatprep.mubr.msk.f32.mxu0 %vm258_vm1, %v5761_v6 }
 0x11e   : > { %4827 = vmatmul.mubr.msk.f32.gmra.mrb[20].mxu1 %vm258_vm1, %v6498_v19  ;;  %5027 = vmatmul.mubr.msk.f32.gmra.mrb[20].mxu0 %vm258_vm1, %v5775_v9 }
 0x11f   : > { %4829 = vmatprep.mubr.msk.f32.mxu1 %vm258_vm1, %v6500_v21  ;;  %5029 = vmatprep.mubr.msk.f32.mxu0 %vm258_vm1, %v5781_v55 }
 0x122   : > { %4830 = vmatmul.mubr.msk.f32.gmra.mrb[22].mxu1 %vm258_vm1, %v6502_v22  ;;  %5030 = vmatmul.mubr.msk.f32.gmra.mrb[22].mxu0 %vm258_vm1, %v5795_v53 }
 0x123   : > { %4832 = vmatprep.mubr.msk.f32.mxu1 %vm258_vm1, %v6504_v37  ;;  %5032 = vmatprep.mubr.msk.f32.mxu0 %vm258_vm1, %v5801_v49 }
 0x126   : > { %4833 = vmatmul.mubr.msk.f32.gmra.mrb[24].mxu1 %vm258_vm1, %v6506_v33  ;;  %5033 = vmatmul.mubr.msk.f32.gmra.mrb[24].mxu0 %vm258_vm1, %v5815_v45 }
 0x127   : > { %4835 = vmatprep.mubr.msk.f32.mxu1 %vm258_vm1, %v6508_v12  ;;  %5035 = vmatprep.mubr.msk.f32.mxu0 %vm258_vm1, %v5821_v41 }
 0x12a   : > { %4836 = vmatmul.mubr.msk.f32.gmra.mrb[26].mxu1 %vm258_vm1, %v6510_v16  ;;  %5036 = vmatmul.mubr.msk.f32.gmra.mrb[26].mxu0 %vm258_vm1, %v6518_v26 }
 0x12b   : > { %4838 = vmatprep.mubr.msk.f32.mxu1 %vm258_vm1, %v6512_v20  ;;  %5038 = vmatprep.mubr.msk.f32.mxu0 %vm258_vm1, %v6519_v27 }
 0x12e   : > { %4839 = vmatmul.mubr.msk.f32.gmra.mrb[28].mxu1 %vm258_vm1, %v6520_v30  ;;  %5039 = vmatmul.mubr.msk.f32.gmra.mrb[28].mxu0 %vm258_vm1, %v6521_v31 }
 0x12f   : > { %4841 = vmatprep.mubr.msk.f32.mxu1 %vm258_vm1, %v6169_v1  ;;  %5041 = vmatprep.mubr.msk.f32.mxu0 %vm258_vm1, %v4257_v29 }
 0x132   : > { %4842 = vmatmul.mubr.msk.f32.gmra.mrb[30].mxu1 %vm258_vm1, %v6180_v14  ;;  %5042 = vmatmul.mubr.msk.f32.gmra.mrb[30].mxu0 %vm258_vm1, %v4258_v32 }
 0x1a9   : > { %v4748_v34 = vpop.f32.mrb[0].mxu1 }
 0x1aa   : > { %v1498_v35 = vpop.f32.mrb[1].mxu1 }
 0x1ad   : > { %v4751_v36 = vpop.f32.mrb[2].mxu1 }
 0x1ae   : > { %v1508_v38 = vpop.f32.mrb[3].mxu1 }
 0x1b1   : > { %v4754_v39 = vpop.f32.mrb[4].mxu1 }
 0x1b2   : > { %v1518_v40 = vpop.f32.mrb[5].mxu1 }
 0x1b5   : > { %v4757_v41 = vpop.f32.mrb[6].mxu1 }
 0x1b6   : > { %v1528_v42 = vpop.f32.mrb[7].mxu1 }
 0x1b9   : > { %v4760_v43 = vpop.f32.mrb[8].mxu1 }
 0x1ba   : > { %v1538_v44 = vpop.f32.mrb[9].mxu1 }
 0x1bd   : > { %v4763_v45 = vpop.f32.mrb[10].mxu1 }
 0x1be   : > { %v1548_v46 = vpop.f32.mrb[11].mxu1 }
 0x1c1   : > { %v4766_v47 = vpop.f32.mrb[12].mxu1 }
 0x1c2   : > { %v1558_v48 = vpop.f32.mrb[13].mxu1 }
 0x1c5   : > { %v4769_v49 = vpop.f32.mrb[14].mxu1 }
 0x1c6   : > { %v6322_v50 = vpop.f32.mrb[15].mxu1 }
 0x1c9   : > { %v4998_v51 = vpop.f32.mrb[0].mxu0 }
 0x1ca   : > { %v5046_v53 = vadd.f32 %v4998_v51, %v4748_v34  ;;  %v3449_v54 = vpop.f32.mrb[1].mxu0 }
 0x1cb   : > { %v5047_v56 = vadd.f32 %v3449_v54, %v1498_v35 }
 0x1cc   : > { %v3648_v58 = vadd.f32 %v5046_v53, %v6328_v52 }
 0x1cd   : > { %v3647_v59 = vadd.f32 %v5047_v56, %v6328_v52  ;;  %v5001_v60 = vpop.f32.mrb[2].mxu0 }
 0x1ce   : > { %3680 = vst [vmem:[%s6333_s20 + $0x8] sm:$0xff] %v3648_v58  ;;  %v5048_v62 = vadd.f32 %v5001_v60, %v4751_v36  ;;  %v3459_v63 = vpop.f32.mrb[3].mxu0 }
 0x1cf   : > { %3679 = vst [vmem:[%s6333_s20] sm:$0xff] %v3647_v59  ;;  %v5049_v0 = vadd.f32 %v3459_v63, %v1508_v38 }
 0x1d0   : > { %v3650_v2 = vadd.f32 %v5048_v62, %v6328_v52 }
 0x1d1   : > { %v3649_v4 = vadd.f32 %v5049_v0, %v6328_v52  ;;  %v5004_v5 = vpop.f32.mrb[4].mxu0 }
 0x1d2   : > { %3682 = vst [vmem:[%s6333_s20 + $0x18] sm:$0xff] %v3650_v2  ;;  %v5050_v6 = vadd.f32 %v5004_v5, %v4754_v39  ;;  %v3469_v7 = vpop.f32.mrb[5].mxu0 }
 0x1d3   : > { %3681 = vst [vmem:[%s6333_s20 + $0x10] sm:$0xff] %v3649_v4  ;;  %v5051_v9 = vadd.f32 %v3469_v7, %v1518_v40 }
 0x1d4   : > { %v3652_v10 = vadd.f32 %v5050_v6, %v6328_v52 }
 0x1d5   : > { %v3651_v55 = vadd.f32 %v5051_v9, %v6328_v52  ;;  %v5007_v57 = vpop.f32.mrb[6].mxu0 }
 0x1d6   : > { %3684 = vst [vmem:[%s6333_s20 + $0x28] sm:$0xff] %v3652_v10  ;;  %v5052_v28 = vadd.f32 %v5007_v57, %v4757_v41  ;;  %v3479_v24 = vpop.f32.mrb[7].mxu0 }
 0x1d7   : > { %3683 = vst [vmem:[%s6333_s20 + $0x20] sm:$0xff] %v3651_v55  ;;  %v5053_v25 = vadd.f32 %v3479_v24, %v1528_v42 }
 0x1d8   : > { %v3654_v8 = vadd.f32 %v5052_v28, %v6328_v52 }
 0x1d9   : > { %v3653_v11 = vadd.f32 %v5053_v25, %v6328_v52  ;;  %v5010_v13 = vpop.f32.mrb[8].mxu0 }
 0x1da   : > { %3686 = vst [vmem:[%s6333_s20 + $0x38] sm:$0xff] %v3654_v8  ;;  %v5054_v15 = vadd.f32 %v5010_v13, %v4760_v43  ;;  %v3489_v17 = vpop.f32.mrb[9].mxu0 }
 0x1db   : > { %3685 = vst [vmem:[%s6333_s20 + $0x30] sm:$0xff] %v3653_v11  ;;  %v5055_v19 = vadd.f32 %v3489_v17, %v1538_v44 }
 0x1dc   : > { %v3656_v21 = vadd.f32 %v5054_v15, %v6328_v52 }
 0x1dd   : > { %v3655_v22 = vadd.f32 %v5055_v19, %v6328_v52  ;;  %v5013_v37 = vpop.f32.mrb[10].mxu0 }
 0x1de   : > { %3688 = vst [vmem:[%s6333_s20 + $0x48] sm:$0xff] %v3656_v21  ;;  %v5056_v33 = vadd.f32 %v5013_v37, %v4763_v45  ;;  %v3499_v12 = vpop.f32.mrb[11].mxu0 }
 0x1df   : > { %3687 = vst [vmem:[%s6333_s20 + $0x40] sm:$0xff] %v3655_v22  ;;  %v5057_v16 = vadd.f32 %v3499_v12, %v1548_v46 }
 0x1e0   : > { %v3658_v20 = vadd.f32 %v5056_v33, %v6328_v52 }
 0x1e1   : > { %v3657_v1 = vadd.f32 %v5057_v16, %v6328_v52  ;;  %v5016_v3 = vpop.f32.mrb[12].mxu0 }
 0x1e2   : > { %3690 = vst [vmem:[%s6333_s20 + $0x58] sm:$0xff] %v3658_v20  ;;  %v5058_v61 = vadd.f32 %v5016_v3, %v4766_v47  ;;  %v3509_v14 = vpop.f32.mrb[13].mxu0 }
 0x1e3   : > { %3689 = vst [vmem:[%s6333_s20 + $0x50] sm:$0xff] %v3657_v1  ;;  %v5059_v18 = vadd.f32 %v3509_v14, %v1558_v48 }
 0x1e4   : > { %v3660_v23 = vadd.f32 %v5058_v61, %v6328_v52 }
 0x1e5   : > { %v3659_v26 = vadd.f32 %v5059_v18, %v6328_v52  ;;  %v5019_v27 = vpop.f32.mrb[14].mxu0 }
 0x1e6   : > { %3692 = vst [vmem:[%s6333_s20 + $0x68] sm:$0xff] %v3660_v23  ;;  %v5060_v29 = vadd.f32 %v5019_v27, %v4769_v49  ;;  %v3519_v30 = vpop.f32.mrb[15].mxu0 }
 0x1e7   : > { %3691 = vst [vmem:[%s6333_s20 + $0x60] sm:$0xff] %v3659_v26  ;;  %v5061_v31 = vadd.f32 %v3519_v30, %v6322_v50 }
 0x1e8   : > { %v3662_v32 = vadd.f32 %v5060_v29, %v6328_v52 }
 0x1e9   : > { %v3661_v34 = vadd.f32 %v5061_v31, %v6328_v52  ;;  %v4822_v35 = vpop.f32.mrb[16].mxu1  ;;  %v5022_v36 = vpop.f32.mrb[16].mxu0 }
 0x1ea   : > { %3694 = vst [vmem:[%s6333_s20 + $0x78] sm:$0xff] %v3662_v32  ;;  %v5062_v38 = vadd.f32 %v5022_v36, %v4822_v35  ;;  %v1968_v39 = vpop.f32.mrb[17].mxu1  ;;  %v3529_v40 = vpop.f32.mrb[17].mxu0 }
 0x1eb   : > { %3693 = vst [vmem:[%s6333_s20 + $0x70] sm:$0xff] %v3661_v34  ;;  %v5063_v41 = vadd.f32 %v3529_v40, %v1968_v39 }
 0x1ec   : > { %v3664_v42 = vadd.f32 %v5062_v38, %v6328_v52 }
 0x1ed   : > { %v3663_v43 = vadd.f32 %v5063_v41, %v6328_v52  ;;  %v4825_v44 = vpop.f32.mrb[18].mxu1  ;;  %v5025_v45 = vpop.f32.mrb[18].mxu0 }
 0x1ee   : > { %3696 = vst [vmem:[%s6333_s20 + $0x88] sm:$0xff] %v3664_v42  ;;  %v5064_v46 = vadd.f32 %v5025_v45, %v4825_v44  ;;  %v1978_v47 = vpop.f32.mrb[19].mxu1  ;;  %v3539_v48 = vpop.f32.mrb[19].mxu0 }
 0x1ef   : > { %3695 = vst [vmem:[%s6333_s20 + $0x80] sm:$0xff] %v3663_v43  ;;  %v5065_v49 = vadd.f32 %v3539_v48, %v1978_v47 }
 0x1f0   : > { %v3666_v50 = vadd.f32 %v5064_v46, %v6328_v52 }
 0x1f1   : > { %v3665_v51 = vadd.f32 %v5065_v49, %v6328_v52  ;;  %v4828_v53 = vpop.f32.mrb[20].mxu1  ;;  %v5028_v54 = vpop.f32.mrb[20].mxu0 }
 0x1f2   : > { %3698 = vst [vmem:[%s6333_s20 + $0x98] sm:$0xff] %v3666_v50  ;;  %v5066_v56 = vadd.f32 %v5028_v54, %v4828_v53  ;;  %v1988_v58 = vpop.f32.mrb[21].mxu1  ;;  %v3549_v59 = vpop.f32.mrb[21].mxu0 }
 0x1f3   : > { %3697 = vst [vmem:[%s6333_s20 + $0x90] sm:$0xff] %v3665_v51  ;;  %v5067_v60 = vadd.f32 %v3549_v59, %v1988_v58 }
 0x1f4   : > { %v3668_v62 = vadd.f32 %v5066_v56, %v6328_v52 }
 0x1f5   : > { %v3667_v63 = vadd.f32 %v5067_v60, %v6328_v52  ;;  %v4831_v0 = vpop.f32.mrb[22].mxu1  ;;  %v5031_v2 = vpop.f32.mrb[22].mxu0 }
 0x1f6   : > { %3700 = vst [vmem:[%s6333_s20 + $0xa8] sm:$0xff] %v3668_v62  ;;  %v5068_v4 = vadd.f32 %v5031_v2, %v4831_v0  ;;  %v1998_v5 = vpop.f32.mrb[23].mxu1  ;;  %v3559_v6 = vpop.f32.mrb[23].mxu0 }
 0x1f7   : > { %3699 = vst [vmem:[%s6333_s20 + $0xa0] sm:$0xff] %v3667_v63  ;;  %v5069_v7 = vadd.f32 %v3559_v6, %v1998_v5 }
 0x1f8   : > { %v3670_v9 = vadd.f32 %v5068_v4, %v6328_v52 }
 0x1f9   : > { %v3669_v10 = vadd.f32 %v5069_v7, %v6328_v52  ;;  %v4834_v55 = vpop.f32.mrb[24].mxu1  ;;  %v5034_v57 = vpop.f32.mrb[24].mxu0 }
 0x1fa   : > { %3702 = vst [vmem:[%s6333_s20 + $0xb8] sm:$0xff] %v3670_v9  ;;  %v5070_v28 = vadd.f32 %v5034_v57, %v4834_v55  ;;  %v2008_v24 = vpop.f32.mrb[25].mxu1  ;;  %v3569_v25 = vpop.f32.mrb[25].mxu0 }
 0x1fb   : > { %3701 = vst [vmem:[%s6333_s20 + $0xb0] sm:$0xff] %v3669_v10  ;;  %v5071_v8 = vadd.f32 %v3569_v25, %v2008_v24 }
 0x1fc   : > { %v3672_v11 = vadd.f32 %v5070_v28, %v6328_v52 }
 0x1fd   : > { %v3671_v13 = vadd.f32 %v5071_v8, %v6328_v52  ;;  %v4837_v15 = vpop.f32.mrb[26].mxu1  ;;  %v5037_v17 = vpop.f32.mrb[26].mxu0 }
 0x1fe   : > { %3704 = vst [vmem:[%s6333_s20 + $0xc8] sm:$0xff] %v3672_v11  ;;  %v5072_v19 = vadd.f32 %v5037_v17, %v4837_v15  ;;  %v2018_v21 = vpop.f32.mrb[27].mxu1  ;;  %v3579_v22 = vpop.f32.mrb[27].mxu0 }
 0x1ff   : > { %3703 = vst [vmem:[%s6333_s20 + $0xc0] sm:$0xff] %v3671_v13  ;;  %v5073_v37 = vadd.f32 %v3579_v22, %v2018_v21 }
 0x200   : > { %v3674_v33 = vadd.f32 %v5072_v19, %v6328_v52 }
 0x201   : > { %v3673_v12 = vadd.f32 %v5073_v37, %v6328_v52  ;;  %v4840_v16 = vpop.f32.mrb[28].mxu1  ;;  %v5040_v20 = vpop.f32.mrb[28].mxu0 }
 0x202   : > { %3706 = vst [vmem:[%s6333_s20 + $0xd8] sm:$0xff] %v3674_v33  ;;  %v5074_v1 = vadd.f32 %v5040_v20, %v4840_v16  ;;  %v2028_v3 = vpop.f32.mrb[29].mxu1  ;;  %v3589_v61 = vpop.f32.mrb[29].mxu0 }
 0x203   : > { %3705 = vst [vmem:[%s6333_s20 + $0xd0] sm:$0xff] %v3673_v12  ;;  %v5075_v14 = vadd.f32 %v3589_v61, %v2028_v3 }
 0x204   : > { %v3676_v18 = vadd.f32 %v5074_v1, %v6328_v52 }
 0x205   : > { %v3675_v23 = vadd.f32 %v5075_v14, %v6328_v52  ;;  %v4843_v26 = vpop.f32.mrb[30].mxu1  ;;  %v5043_v27 = vpop.f32.mrb[30].mxu0 }
 0x206   : > { %3708 = vst [vmem:[%s6333_s20 + $0xe8] sm:$0xff] %v3676_v18  ;;  %v5076_v29 = vadd.f32 %v5043_v27, %v4843_v26  ;;  %v2038_v30 = vpop.f32.mrb[31].mxu1  ;;  %v3599_v31 = vpop.f32.mrb[31].mxu0 }
 0x207   : > { %3707 = vst [vmem:[%s6333_s20 + $0xe0] sm:$0xff] %v3675_v23  ;;  %v5077_v32 = vadd.f32 %v3599_v31, %v2038_v30 }
 0x208   : > { %v3678_v34 = vadd.f32 %v5076_v29, %v6328_v52 }
 0x209   : > { %v3677_v35 = vadd.f32 %v5077_v32, %v6328_v52 }
 0x20a   : > { %3710 = vst [vmem:[%s6333_s20 + $0xf8] sm:$0xff] %v3678_v34 }
 0x20b   : > { %3709 = vst [vmem:[%s6333_s20 + $0xf0] sm:$0xff] %v3677_v35 }
 0x20c PF: > { %s13_s14 = sadd.s32 1, %s5349_s14   ;;  %s6522_s12 = smov %s5345_s13 }
 0x20d   : > { %p10_p5 = scmp.ge.s32.totalorder %s13_s14, 4   ;;  %s6523_s13 = smov %s6525_s15 }
 0x20f   :  { %12 = sbr.rel (!%p10_p5) target bundleno = 2 (0x2), region = 72 }

</bundles_post_ra>
